<compile_context>
chip_gen: v5e
topology: v5e:2x2
jax: 0.10.0
libtpu: 0.0.40
codegen_flags: <defaults>
</compile_context>

<pallas_src>
import jax
import jax.numpy as jnp
from jax.experimental import pallas as pl
from jax.experimental.pallas import tpu as pltpu

DEPTH = 4


def _round_up(n, m):
    return ((n + m - 1) // m) * m


def _prelu(x, a):
    # PReLU(x) = max(0, x) + a * min(0, x)
    return jnp.where(x >= 0, x, a * x)


def pscn_kernel(a_ref, x_ref, *refs):
    """One batch tile of PSCN: 4 cascaded Linear+PReLU stages with fused split/concat."""
    out_ref = refs[-1]
    p = refs[:-1]  # 4 refs (Wp, bp, Wn, bn) per layer 0..2, then (W, b) for layer 3

    h = x_ref[...].astype(jnp.bfloat16)  # MXU-native operand dtype; f32 accumulation below
    parts = []
    for i in range(DEPTH - 1):
        wp, bp, wn, bn = p[4 * i], p[4 * i + 1], p[4 * i + 2], p[4 * i + 3]
        a = a_ref[i]
        # columns that go straight to the output
        part = jnp.dot(h, wp[...], preferred_element_type=jnp.float32) + bp[...]
        parts.append(_prelu(part, a))
        # columns feeding the next stage
        nxt = jnp.dot(h, wn[...], preferred_element_type=jnp.float32) + bn[...]
        h = _prelu(nxt, a).astype(jnp.bfloat16)
    wl, bl = p[-2], p[-1]
    last = jnp.dot(h, wl[...], preferred_element_type=jnp.float32) + bl[...]
    parts.append(_prelu(last, a_ref[DEPTH - 1]))
    # single lane-dense store of the whole (block_m, output_dim) tile
    out_ref[...] = jnp.concatenate(parts, axis=-1).astype(out_ref.dtype)


def init_pscn_params(key, input_dim, output_dim, depth=DEPTH):
    """Kaiming-uniform-like init (bias = 0). Weights stored transposed (in, out) in bf16
    and pre-split into the "output part" / "next stage" column groups."""
    assert depth >= 1
    min_dim = 2 ** (depth - 1)
    assert output_dim >= min_dim and output_dim % min_dim == 0
    layers = []
    in_dim, out_dim = input_dim, output_dim
    keys = jax.random.split(key, depth)
    for i in range(depth):
        # kaiming_uniform_(nonlinearity='leaky_relu', a=0): gain=sqrt(2), bound=gain*sqrt(3/fan_in)
        bound = (6.0 / in_dim) ** 0.5
        w_t = jax.random.uniform(keys[i], (in_dim, out_dim), jnp.float32, -bound, bound)
        b = jnp.zeros((1, out_dim), jnp.float32)
        if i < depth - 1:
            s = out_dim // 2
            layers.append((w_t[:, :s].astype(jnp.bfloat16), b[:, :s],
                           w_t[:, s:].astype(jnp.bfloat16), b[:, s:]))
        else:
            layers.append((w_t.astype(jnp.bfloat16), b))
        in_dim, out_dim = out_dim // 2, out_dim // 2
    # nn.PReLU() default (single shared slope instance at init) -> all layers start at 0.25.
    prelu_a = jnp.full((depth,), 0.25, jnp.float32)
    return {"layers": layers, "prelu_a": prelu_a}


def _choose_block_m(batch, requested):
    bm = max(8, min(_round_up(requested, 8), _round_up(batch, 8)))
    # v7x has 2 TensorCores: if the whole batch would land in a single big tile, halve
    # it so the "parallel" batch axis can shard across both cores (no-op on v5e/v6e).
    if _round_up(batch, bm) // bm < 2 and bm > 128:
        bm = _round_up(pl.cdiv(bm, 2), 8)
    return bm


def pscn_forward(x, params, output_dim, *, block_m=128):
    B, in_dim = x.shape
    a = params["prelu_a"]
    flat = []
    for layer in params["layers"]:
        flat.extend(layer)

    bm = _choose_block_m(B, block_m)
    B_pad = _round_up(B, bm)
    x_pad = jnp.pad(x, ((0, B_pad - B), (0, 0))) if B_pad != B else x
    grid_m = B_pad // bm

    def replicated(arr):
        # grid-invariant full-array block (DMA'd once; block index is always 0)
        return pl.BlockSpec(arr.shape, lambda i: (0,) * arr.ndim)

    # ---- scheduler cost hint ------------------------------------------------
    flops = 0
    d_in, d_out = in_dim, output_dim
    for _ in range(DEPTH):
        flops += 2 * B_pad * d_in * d_out
        d_in, d_out = d_out // 2, d_out // 2
    param_bytes = sum(int(p.size) * p.dtype.itemsize for p in flat)
    param_bytes += int(a.size) * a.dtype.itemsize
    bytes_accessed = B_pad * in_dim * 4 + B_pad * output_dim * 4 + param_bytes
    cost = pl.CostEstimate(flops=flops, transcendentals=0, bytes_accessed=bytes_accessed)

    # ---- explicit VMEM budget ------------------------------------------------
    # double-buffered x/out tiles + params + in-kernel temporary headroom,
    # clamped to [32 MiB, 64 MiB] (64 MiB = v7x physical VMEM per TC).
    tile_bytes = 2 * bm * (in_dim + output_dim) * 4
    needed = tile_bytes + 2 * param_bytes + 2 * bm * output_dim * 4
    vmem_limit = int(min(max(4 * needed, 32 * 1024 * 1024), 64 * 1024 * 1024))

    out = pl.pallas_call(
        pscn_kernel,
        out_shape=jax.ShapeDtypeStruct((B_pad, output_dim), jnp.float32),
        grid=(grid_m,),
        in_specs=[pl.BlockSpec(memory_space=pltpu.MemorySpace.SMEM)]   # PReLU slopes (4,)
                 + [pl.BlockSpec((bm, in_dim), lambda i: (i, 0))]      # x batch tile
                 + [replicated(p) for p in flat],                      # weights / biases
        out_specs=pl.BlockSpec((bm, output_dim), lambda i: (i, 0)),
        compiler_params=pltpu.CompilerParams(
            dimension_semantics=("parallel",),
            vmem_limit_bytes=vmem_limit),
        cost_estimate=cost,
    )(a, x_pad, *flat)

    return out[:B] if B_pad != B else out


def pscn_reference(x, params, output_dim, depth=DEPTH):
    """Plain-JAX reference mirroring the PyTorch forward (full Linear -> PReLU -> split),
    using the same bf16-operand / f32-accumulate matmul dtypes as the kernel."""
    a = params["prelu_a"]
    parts = []
    h = x
    for i in range(depth):
        layer = params["layers"][i]
        if i < depth - 1:
            wp, bp, wn, bn = layer
            w = jnp.concatenate([wp, wn], axis=1)
            b = jnp.concatenate([bp, bn], axis=1)
        else:
            w, b = layer
        y = jnp.dot(h.astype(jnp.bfloat16), w, preferred_element_type=jnp.float32) + b
        y = jnp.where(y >= 0, y, a[i] * y)
        if i < depth - 1:
            s = output_dim // 2 ** (i + 1)
            parts.append(y[:, :s])
            h = y[:, s:]
        else:
            parts.append(y)
    return jnp.concatenate(parts, axis=-1)


if __name__ == "__main__":
    key = jax.random.PRNGKey(0)
    k_param, k_x = jax.random.split(key)

    batch = 200          # ragged: exercises host padding + a 2-step grid (block_m=128)
    input_dim = 32
    output_dim = 64      # depth=4 -> min_dim=8, 64 % 8 == 0

    params = init_pscn_params(k_param, input_dim, output_dim)
    x = jax.random.normal(k_x, (batch, input_dim), jnp.float32)

    out = pscn_forward(x, params, output_dim, block_m=128)
    out = jax.block_until_ready(out)

    ref = pscn_reference(x, params, output_dim)
    assert out.shape == (batch, output_dim)
    assert jnp.allclose(out, ref, atol=1e-3, rtol=1e-3), "Pallas output mismatch vs reference"

    print("KERNEL_OK")
</pallas_src>

<mosaic_0001>
module attributes {stable_mosaic.version = 11 : i64} {
  func.func @pscn_kernel(%arg0: i32, %arg1: memref<4xf32, #tpu.memory_space<smem>>, %arg2: memref<128x32xf32, #tpu.memory_space<vmem>>, %arg3: memref<32x32xbf16, #tpu.memory_space<vmem>>, %arg4: memref<1x32xf32, #tpu.memory_space<vmem>>, %arg5: memref<32x32xbf16, #tpu.memory_space<vmem>>, %arg6: memref<1x32xf32, #tpu.memory_space<vmem>>, %arg7: memref<32x16xbf16, #tpu.memory_space<vmem>>, %arg8: memref<1x16xf32, #tpu.memory_space<vmem>>, %arg9: memref<32x16xbf16, #tpu.memory_space<vmem>>, %arg10: memref<1x16xf32, #tpu.memory_space<vmem>>, %arg11: memref<16x8xbf16, #tpu.memory_space<vmem>>, %arg12: memref<1x8xf32, #tpu.memory_space<vmem>>, %arg13: memref<16x8xbf16, #tpu.memory_space<vmem>>, %arg14: memref<1x8xf32, #tpu.memory_space<vmem>>, %arg15: memref<8x8xbf16, #tpu.memory_space<vmem>>, %arg16: memref<1x8xf32, #tpu.memory_space<vmem>>, %arg17: memref<128x64xf32, #tpu.memory_space<vmem>>) attributes {dimension_semantics = [#tpu.dimension_semantics<parallel>], iteration_bounds = array<i64: 2>, scalar_prefetch = 0 : i64, scratch_operands = 0 : i64, tpu.core_type = #tpu.core_type<tc>, window_params = [{transform_indices = @transform_0, window_bounds = array<i64: 4>}, {transform_indices = @transform_1, window_bounds = array<i64: 128, 32>}, {pipeline_mode = #tpu.pipeline_mode<synchronous>, transform_indices = @transform_2, window_bounds = array<i64: 32, 32>}, {pipeline_mode = #tpu.pipeline_mode<synchronous>, transform_indices = @transform_3, window_bounds = array<i64: 1, 32>}, {pipeline_mode = #tpu.pipeline_mode<synchronous>, transform_indices = @transform_4, window_bounds = array<i64: 32, 32>}, {pipeline_mode = #tpu.pipeline_mode<synchronous>, transform_indices = @transform_5, window_bounds = array<i64: 1, 32>}, {pipeline_mode = #tpu.pipeline_mode<synchronous>, transform_indices = @transform_6, window_bounds = array<i64: 32, 16>}, {pipeline_mode = #tpu.pipeline_mode<synchronous>, transform_indices = @transform_7, window_bounds = array<i64: 1, 16>}, {pipeline_mode = #tpu.pipeline_mode<synchronous>, transform_indices = @transform_8, window_bounds = array<i64: 32, 16>}, {pipeline_mode = #tpu.pipeline_mode<synchronous>, transform_indices = @transform_9, window_bounds = array<i64: 1, 16>}, {pipeline_mode = #tpu.pipeline_mode<synchronous>, transform_indices = @transform_10, window_bounds = array<i64: 16, 8>}, {pipeline_mode = #tpu.pipeline_mode<synchronous>, transform_indices = @transform_11, window_bounds = array<i64: 1, 8>}, {pipeline_mode = #tpu.pipeline_mode<synchronous>, transform_indices = @transform_12, window_bounds = array<i64: 16, 8>}, {pipeline_mode = #tpu.pipeline_mode<synchronous>, transform_indices = @transform_13, window_bounds = array<i64: 1, 8>}, {pipeline_mode = #tpu.pipeline_mode<synchronous>, transform_indices = @transform_14, window_bounds = array<i64: 8, 8>}, {pipeline_mode = #tpu.pipeline_mode<synchronous>, transform_indices = @transform_15, window_bounds = array<i64: 1, 8>}, {transform_indices = @transform_16, window_bounds = array<i64: 128, 64>}]} {
    %c0 = arith.constant 0 : index
    %c0_0 = arith.constant 0 : index
    %0 = vector.load %arg2[%c0, %c0_0] : memref<128x32xf32, #tpu.memory_space<vmem>>, vector<128x32xf32>
    %1 = arith.truncf %0 : vector<128x32xf32> to vector<128x32xbf16>
    %c0_1 = arith.constant 0 : index
    %2 = memref.load %arg1[%c0_1] : memref<4xf32, #tpu.memory_space<smem>>
    %c0_2 = arith.constant 0 : index
    %c0_3 = arith.constant 0 : index
    %3 = vector.load %arg3[%c0_2, %c0_3] : memref<32x32xbf16, #tpu.memory_space<vmem>>, vector<32x32xbf16>
    %cst = arith.constant dense<0.000000e+00> : vector<128x32xf32>
    %4 = tpu.matmul %1, %3, %cst {dimension_numbers = #tpu.dot_dimension_numbers<[1], [0], [0], [1], [0, 0, 1, 1], [], []>} : vector<128x32xbf16>, vector<32x32xbf16>, vector<128x32xf32> -> vector<128x32xf32>
    %c0_4 = arith.constant 0 : index
    %c0_5 = arith.constant 0 : index
    %5 = vector.load %arg4[%c0_4, %c0_5] : memref<1x32xf32, #tpu.memory_space<vmem>>, vector<1x32xf32>
    %6 = vector.broadcast %5 : vector<1x32xf32> to vector<128x32xf32>
    %7 = arith.addf %4, %6 : vector<128x32xf32>
    %cst_6 = arith.constant 0.000000e+00 : f32
    %8 = vector.broadcast %cst_6 : f32 to vector<128x32xf32>
    %9 = arith.cmpf oge, %7, %8 : vector<128x32xf32>
    %10 = vector.broadcast %2 : f32 to vector<128x32xf32>
    %11 = arith.mulf %10, %7 : vector<128x32xf32>
    %12 = arith.select %9, %7, %11 : vector<128x32xi1>, vector<128x32xf32>
    %c0_7 = arith.constant 0 : index
    %c0_8 = arith.constant 0 : index
    %13 = vector.load %arg5[%c0_7, %c0_8] : memref<32x32xbf16, #tpu.memory_space<vmem>>, vector<32x32xbf16>
    %cst_9 = arith.constant dense<0.000000e+00> : vector<128x32xf32>
    %14 = tpu.matmul %1, %13, %cst_9 {dimension_numbers = #tpu.dot_dimension_numbers<[1], [0], [0], [1], [0, 0, 1, 1], [], []>} : vector<128x32xbf16>, vector<32x32xbf16>, vector<128x32xf32> -> vector<128x32xf32>
    %c0_10 = arith.constant 0 : index
    %c0_11 = arith.constant 0 : index
    %15 = vector.load %arg6[%c0_10, %c0_11] : memref<1x32xf32, #tpu.memory_space<vmem>>, vector<1x32xf32>
    %16 = vector.broadcast %15 : vector<1x32xf32> to vector<128x32xf32>
    %17 = arith.addf %14, %16 : vector<128x32xf32>
    %cst_12 = arith.constant 0.000000e+00 : f32
    %18 = vector.broadcast %cst_12 : f32 to vector<128x32xf32>
    %19 = arith.cmpf oge, %17, %18 : vector<128x32xf32>
    %20 = vector.broadcast %2 : f32 to vector<128x32xf32>
    %21 = arith.mulf %20, %17 : vector<128x32xf32>
    %22 = arith.select %19, %17, %21 : vector<128x32xi1>, vector<128x32xf32>
    %23 = arith.truncf %22 : vector<128x32xf32> to vector<128x32xbf16>
    %c1 = arith.constant 1 : index
    %24 = memref.load %arg1[%c1] : memref<4xf32, #tpu.memory_space<smem>>
    %c0_13 = arith.constant 0 : index
    %c0_14 = arith.constant 0 : index
    %25 = vector.load %arg7[%c0_13, %c0_14] : memref<32x16xbf16, #tpu.memory_space<vmem>>, vector<32x16xbf16>
    %cst_15 = arith.constant dense<0.000000e+00> : vector<128x16xf32>
    %26 = tpu.matmul %23, %25, %cst_15 {dimension_numbers = #tpu.dot_dimension_numbers<[1], [0], [0], [1], [0, 0, 1, 1], [], []>} : vector<128x32xbf16>, vector<32x16xbf16>, vector<128x16xf32> -> vector<128x16xf32>
    %c0_16 = arith.constant 0 : index
    %c0_17 = arith.constant 0 : index
    %27 = vector.load %arg8[%c0_16, %c0_17] : memref<1x16xf32, #tpu.memory_space<vmem>>, vector<1x16xf32>
    %28 = vector.broadcast %27 : vector<1x16xf32> to vector<128x16xf32>
    %29 = arith.addf %26, %28 : vector<128x16xf32>
    %cst_18 = arith.constant 0.000000e+00 : f32
    %30 = vector.broadcast %cst_18 : f32 to vector<128x16xf32>
    %31 = arith.cmpf oge, %29, %30 : vector<128x16xf32>
    %32 = vector.broadcast %24 : f32 to vector<128x16xf32>
    %33 = arith.mulf %32, %29 : vector<128x16xf32>
    %34 = arith.select %31, %29, %33 : vector<128x16xi1>, vector<128x16xf32>
    %c0_19 = arith.constant 0 : index
    %c0_20 = arith.constant 0 : index
    %35 = vector.load %arg9[%c0_19, %c0_20] : memref<32x16xbf16, #tpu.memory_space<vmem>>, vector<32x16xbf16>
    %cst_21 = arith.constant dense<0.000000e+00> : vector<128x16xf32>
    %36 = tpu.matmul %23, %35, %cst_21 {dimension_numbers = #tpu.dot_dimension_numbers<[1], [0], [0], [1], [0, 0, 1, 1], [], []>} : vector<128x32xbf16>, vector<32x16xbf16>, vector<128x16xf32> -> vector<128x16xf32>
    %c0_22 = arith.constant 0 : index
    %c0_23 = arith.constant 0 : index
    %37 = vector.load %arg10[%c0_22, %c0_23] : memref<1x16xf32, #tpu.memory_space<vmem>>, vector<1x16xf32>
    %38 = vector.broadcast %37 : vector<1x16xf32> to vector<128x16xf32>
    %39 = arith.addf %36, %38 : vector<128x16xf32>
    %cst_24 = arith.constant 0.000000e+00 : f32
    %40 = vector.broadcast %cst_24 : f32 to vector<128x16xf32>
    %41 = arith.cmpf oge, %39, %40 : vector<128x16xf32>
    %42 = vector.broadcast %24 : f32 to vector<128x16xf32>
    %43 = arith.mulf %42, %39 : vector<128x16xf32>
    %44 = arith.select %41, %39, %43 : vector<128x16xi1>, vector<128x16xf32>
    %45 = arith.truncf %44 : vector<128x16xf32> to vector<128x16xbf16>
    %c2 = arith.constant 2 : index
    %46 = memref.load %arg1[%c2] : memref<4xf32, #tpu.memory_space<smem>>
    %c0_25 = arith.constant 0 : index
    %c0_26 = arith.constant 0 : index
    %47 = vector.load %arg11[%c0_25, %c0_26] : memref<16x8xbf16, #tpu.memory_space<vmem>>, vector<16x8xbf16>
    %cst_27 = arith.constant dense<0.000000e+00> : vector<128x8xf32>
    %48 = tpu.matmul %45, %47, %cst_27 {dimension_numbers = #tpu.dot_dimension_numbers<[1], [0], [0], [1], [0, 0, 1, 1], [], []>} : vector<128x16xbf16>, vector<16x8xbf16>, vector<128x8xf32> -> vector<128x8xf32>
    %c0_28 = arith.constant 0 : index
    %c0_29 = arith.constant 0 : index
    %49 = vector.load %arg12[%c0_28, %c0_29] : memref<1x8xf32, #tpu.memory_space<vmem>>, vector<1x8xf32>
    %50 = vector.broadcast %49 : vector<1x8xf32> to vector<128x8xf32>
    %51 = arith.addf %48, %50 : vector<128x8xf32>
    %cst_30 = arith.constant 0.000000e+00 : f32
    %52 = vector.broadcast %cst_30 : f32 to vector<128x8xf32>
    %53 = arith.cmpf oge, %51, %52 : vector<128x8xf32>
    %54 = vector.broadcast %46 : f32 to vector<128x8xf32>
    %55 = arith.mulf %54, %51 : vector<128x8xf32>
    %56 = arith.select %53, %51, %55 : vector<128x8xi1>, vector<128x8xf32>
    %c0_31 = arith.constant 0 : index
    %c0_32 = arith.constant 0 : index
    %57 = vector.load %arg13[%c0_31, %c0_32] : memref<16x8xbf16, #tpu.memory_space<vmem>>, vector<16x8xbf16>
    %cst_33 = arith.constant dense<0.000000e+00> : vector<128x8xf32>
    %58 = tpu.matmul %45, %57, %cst_33 {dimension_numbers = #tpu.dot_dimension_numbers<[1], [0], [0], [1], [0, 0, 1, 1], [], []>} : vector<128x16xbf16>, vector<16x8xbf16>, vector<128x8xf32> -> vector<128x8xf32>
    %c0_34 = arith.constant 0 : index
    %c0_35 = arith.constant 0 : index
    %59 = vector.load %arg14[%c0_34, %c0_35] : memref<1x8xf32, #tpu.memory_space<vmem>>, vector<1x8xf32>
    %60 = vector.broadcast %59 : vector<1x8xf32> to vector<128x8xf32>
    %61 = arith.addf %58, %60 : vector<128x8xf32>
    %cst_36 = arith.constant 0.000000e+00 : f32
    %62 = vector.broadcast %cst_36 : f32 to vector<128x8xf32>
    %63 = arith.cmpf oge, %61, %62 : vector<128x8xf32>
    %64 = vector.broadcast %46 : f32 to vector<128x8xf32>
    %65 = arith.mulf %64, %61 : vector<128x8xf32>
    %66 = arith.select %63, %61, %65 : vector<128x8xi1>, vector<128x8xf32>
    %67 = arith.truncf %66 : vector<128x8xf32> to vector<128x8xbf16>
    %c0_37 = arith.constant 0 : index
    %c0_38 = arith.constant 0 : index
    %68 = vector.load %arg15[%c0_37, %c0_38] : memref<8x8xbf16, #tpu.memory_space<vmem>>, vector<8x8xbf16>
    %cst_39 = arith.constant dense<0.000000e+00> : vector<128x8xf32>
    %69 = tpu.matmul %67, %68, %cst_39 {dimension_numbers = #tpu.dot_dimension_numbers<[1], [0], [0], [1], [0, 0, 1, 1], [], []>} : vector<128x8xbf16>, vector<8x8xbf16>, vector<128x8xf32> -> vector<128x8xf32>
    %c0_40 = arith.constant 0 : index
    %c0_41 = arith.constant 0 : index
    %70 = vector.load %arg16[%c0_40, %c0_41] : memref<1x8xf32, #tpu.memory_space<vmem>>, vector<1x8xf32>
    %71 = vector.broadcast %70 : vector<1x8xf32> to vector<128x8xf32>
    %72 = arith.addf %69, %71 : vector<128x8xf32>
    %c3 = arith.constant 3 : index
    %73 = memref.load %arg1[%c3] : memref<4xf32, #tpu.memory_space<smem>>
    %cst_42 = arith.constant 0.000000e+00 : f32
    %74 = vector.broadcast %cst_42 : f32 to vector<128x8xf32>
    %75 = arith.cmpf oge, %72, %74 : vector<128x8xf32>
    %76 = vector.broadcast %73 : f32 to vector<128x8xf32>
    %77 = arith.mulf %76, %72 : vector<128x8xf32>
    %78 = arith.select %75, %72, %77 : vector<128x8xi1>, vector<128x8xf32>
    %79 = tpu.concatenate %12, %34, %56, %78 in 1 : vector<128x32xf32>, vector<128x16xf32>, vector<128x8xf32>, vector<128x8xf32> -> vector<128x64xf32>
    %c0_43 = arith.constant 0 : index
    %c0_44 = arith.constant 0 : index
    %80 = vector.load %arg17[%c0_43, %c0_44] : memref<128x64xf32, #tpu.memory_space<vmem>>, vector<128x64xf32>
    tpu.vector_store %arg17[%c0_43, %c0_44], %79 {strides = array<i32>} : memref<128x64xf32, #tpu.memory_space<vmem>>, vector<128x64xf32>,
    return
  }
  func.func @transform_0(%arg0: i32) -> i32 {
    %c0_i32 = arith.constant 0 : i32
    %c0_i32_0 = arith.constant 0 : i32
    return %c0_i32 : i32
  }
  func.func @transform_1(%arg0: i32) -> (i32, i32) {
    %c0_i32 = arith.constant 0 : i32
    %c0_i32_0 = arith.constant 0 : i32
    return %arg0, %c0_i32 : i32, i32
  }
  func.func @transform_2(%arg0: i32) -> (i32, i32) {
    %c0_i32 = arith.constant 0 : i32
    %c0_i32_0 = arith.constant 0 : i32
    %c0_i32_1 = arith.constant 0 : i32
    return %c0_i32, %c0_i32_0 : i32, i32
  }
  func.func @transform_3(%arg0: i32) -> (i32, i32) {
    %c0_i32 = arith.constant 0 : i32
    %c0_i32_0 = arith.constant 0 : i32
    %c0_i32_1 = arith.constant 0 : i32
    return %c0_i32, %c0_i32_0 : i32, i32
  }
  func.func @transform_4(%arg0: i32) -> (i32, i32) {
    %c0_i32 = arith.constant 0 : i32
    %c0_i32_0 = arith.constant 0 : i32
    %c0_i32_1 = arith.constant 0 : i32
    return %c0_i32, %c0_i32_0 : i32, i32
  }
  func.func @transform_5(%arg0: i32) -> (i32, i32) {
    %c0_i32 = arith.constant 0 : i32
    %c0_i32_0 = arith.constant 0 : i32
    %c0_i32_1 = arith.constant 0 : i32
    return %c0_i32, %c0_i32_0 : i32, i32
  }
  func.func @transform_6(%arg0: i32) -> (i32, i32) {
    %c0_i32 = arith.constant 0 : i32
    %c0_i32_0 = arith.constant 0 : i32
    %c0_i32_1 = arith.constant 0 : i32
    return %c0_i32, %c0_i32_0 : i32, i32
  }
  func.func @transform_7(%arg0: i32) -> (i32, i32) {
    %c0_i32 = arith.constant 0 : i32
    %c0_i32_0 = arith.constant 0 : i32
    %c0_i32_1 = arith.constant 0 : i32
    return %c0_i32, %c0_i32_0 : i32, i32
  }
  func.func @transform_8(%arg0: i32) -> (i32, i32) {
    %c0_i32 = arith.constant 0 : i32
    %c0_i32_0 = arith.constant 0 : i32
    %c0_i32_1 = arith.constant 0 : i32
    return %c0_i32, %c0_i32_0 : i32, i32
  }
  func.func @transform_9(%arg0: i32) -> (i32, i32) {
    %c0_i32 = arith.constant 0 : i32
    %c0_i32_0 = arith.constant 0 : i32
    %c0_i32_1 = arith.constant 0 : i32
    return %c0_i32, %c0_i32_0 : i32, i32
  }
  func.func @transform_10(%arg0: i32) -> (i32, i32) {
    %c0_i32 = arith.constant 0 : i32
    %c0_i32_0 = arith.constant 0 : i32
    %c0_i32_1 = arith.constant 0 : i32
    return %c0_i32, %c0_i32_0 : i32, i32
  }
  func.func @transform_11(%arg0: i32) -> (i32, i32) {
    %c0_i32 = arith.constant 0 : i32
    %c0_i32_0 = arith.constant 0 : i32
    %c0_i32_1 = arith.constant 0 : i32
    return %c0_i32, %c0_i32_0 : i32, i32
  }
  func.func @transform_12(%arg0: i32) -> (i32, i32) {
    %c0_i32 = arith.constant 0 : i32
    %c0_i32_0 = arith.constant 0 : i32
    %c0_i32_1 = arith.constant 0 : i32
    return %c0_i32, %c0_i32_0 : i32, i32
  }
  func.func @transform_13(%arg0: i32) -> (i32, i32) {
    %c0_i32 = arith.constant 0 : i32
    %c0_i32_0 = arith.constant 0 : i32
    %c0_i32_1 = arith.constant 0 : i32
    return %c0_i32, %c0_i32_0 : i32, i32
  }
  func.func @transform_14(%arg0: i32) -> (i32, i32) {
    %c0_i32 = arith.constant 0 : i32
    %c0_i32_0 = arith.constant 0 : i32
    %c0_i32_1 = arith.constant 0 : i32
    return %c0_i32, %c0_i32_0 : i32, i32
  }
  func.func @transform_15(%arg0: i32) -> (i32, i32) {
    %c0_i32 = arith.constant 0 : i32
    %c0_i32_0 = arith.constant 0 : i32
    %c0_i32_1 = arith.constant 0 : i32
    return %c0_i32, %c0_i32_0 : i32, i32
  }
  func.func @transform_16(%arg0: i32) -> (i32, i32) {
    %c0_i32 = arith.constant 0 : i32
    %c0_i32_0 = arith.constant 0 : i32
    return %arg0, %c0_i32 : i32, i32
  }
}

</mosaic_0001>

<bundles_post_ra>
// kernel: tpu_custom_call.1
= control target key start
LH: loop header
LB: loop body
LE: loop exit
PB: predicated region body
PF: predicated region fallthrough
CT: control target
= control target key end

     0   :  { %s2760_s0 = inlined_call_operand.vmem [shape: f32[4], index: 0, kind: input, shape index: {}]   ;;  %s2761_s1 = inlined_call_operand.vmem [shape: f32[256,32], index: 1, kind: input, shape index: {}]   ;;  %s2762_s2 = inlined_call_operand.vmem [shape: bf16[32,32], index: 2, kind: input, shape index: {}]   ;;  %s2763_s3 = inlined_call_operand.vmem [shape: f32[1,32], index: 3, kind: input, shape index: {}]   ;;  %s2764_s4 = inlined_call_operand.vmem [shape: bf16[32,32], index: 4, kind: input, shape index: {}]   ;;  %s2765_s5 = inlined_call_operand.vmem [shape: f32[1,32], index: 5, kind: input, shape index: {}]   ;;  %s2766_s6 = inlined_call_operand.vmem [shape: bf16[32,16], index: 6, kind: input, shape index: {}]   ;;  %s2767_s7 = inlined_call_operand.vmem [shape: f32[1,16], index: 7, kind: input, shape index: {}]   ;;  %s2768_s8 = inlined_call_operand.vmem [shape: bf16[32,16], index: 8, kind: input, shape index: {}]   ;;  %s2769_s9 = inlined_call_operand.vmem [shape: f32[1,16], index: 9, kind: input, shape index: {}]   ;;  %s2770_s10 = inlined_call_operand.vmem [shape: bf16[16,8], index: 10, kind: input, shape index: {}]   ;;  %s2771_s11 = inlined_call_operand.vmem [shape: f32[1,8], index: 11, kind: input, shape index: {}]   ;;  %s2772_s12 = inlined_call_operand.vmem [shape: bf16[16,8], index: 12, kind: input, shape index: {}]   ;;  %s2773_s13 = inlined_call_operand.vmem [shape: f32[1,8], index: 13, kind: input, shape index: {}]   ;;  %s2774_s14 = inlined_call_operand.vmem [shape: bf16[8,8], index: 14, kind: input, shape index: {}]   ;;  %s2775_s15 = inlined_call_operand.vmem [shape: f32[1,8], index: 15, kind: input, shape index: {}]   ;;  %s2776_s16 = inlined_call_operand.vmem [shape: f32[256,64], index: 16, kind: output, shape index: {}]  }
   0x1   :  { %2777 = sst [smem:[#allocation5_spill]] %s2760_s0 }
   0x2   :  { %21 = vsyncpa [#allocation3], 0  ;;  %s2088_s21 = smov 0  }
   0x3 LB: > { %s1814_s22 = sadd.s32 4294967295, %s1997_s21   ;;  %p1816_p0 = scmp.ge.s32.totalorder %s1997_s21, 1  ;;  %s1997_s21 = sphi %s2088_s21, %s27_s21  }
   0x4   : > { %p399_p1 = scmp.lt.s32.totalorder %s1997_s21, 3  ;;  %s2778_s25 = sld [smem:[#allocation5_spill]] }
   0x5   : > { %p1950_p3 = scmp.eq.s32.totalorder %s1814_s22, 0  ;;  %s1999_s27 = smov [#allocation2]  }
   0x6   : > { %p400_p2 = pnand %p1816_p0, %p399_p1 }
   0x8   : > { %p1946_p4 = pneg %p400_p2  ;;  %475 = sbr.rel (%p400_p2) target bundleno = 891 (0x37b), region = 84 }
   0xa   : > { %s411_s26 = sshll.u32 %s2778_s25, 4  ;;  %p1947_p5 = pnand %p1950_p3, %p1946_p4  ;;  %s412_s26 = int_to_ptr.vmem [resolvable:$true] %s411_s26 }
   0xc   : > { %1949 = dma.vmem_to_smem (!%p1947_p5), %s412_s26, 16, %s1999_s27, [#allocation3]  }
   0xd   : > { %1992 = dma.done.wait (%p1950_p3), [#allocation3], 16  }
   0xe   : > { %1994 = vsyncadd (%p1950_p3), [#allocation3], 4294967280 }
   0xf   : > { %482 = sfence }
  0x10   : > { %v1927_v0 = vld [vmem:[%s2762_s2 + $0x8] sm:$0xff]  ;;  %s1821_s17 = sshll.u32 %s1814_s22, 4  ;;  %v1926_v2 = vld [vmem:[%s2762_s2] sm:$0xff]  ;;  %vm585_vm0 = vcmask 261120   ;;  %s564_s0 = sld [smem:[#allocation2]] }
  0x11   : > { %v1929_v1 = vld [vmem:[%s2764_s4 + $0x8] sm:$0xff]  ;;  %p528_p6 = scmp.lt.s32.totalorder %s1821_s17, 31  ;;  %v1928_v3 = vld [vmem:[%s2764_s4] sm:$0xff]  ;;  %1936 = vmatpush.bf16.msra.mxu3 %v1927_v0  ;;  %616 = vmatpush.bf16.msra.mxu0 %v1927_v0  ;;  %s1857_s28 = sld [smem:[#allocation2 + $0x1]] }
  0x12   : > { %734 = vmatpush.bf16.msra.mxu1 %v1929_v1  ;;  %v1931_v28 = vld [vmem:[%s2766_s6 + $0x8] sm:$0xff]  ;;  %v1930_v29 = vld [vmem:[%s2766_s6] sm:$0xff]  ;;  %s2001_s19 = smov 48   ;;  %s1923_s20 = sld [smem:[#allocation2 + $0x3]] }
  0x13   : > { %s2780_s17 = smov (!%p528_p6, %s1821_s17), 31  ;;  %884 = vmatpush.bf16.msra.mxu2 %v1931_v28  ;;  %v2162_v30 = vld [vmem:[%s2765_s5] ss:$0 sm:$0xff]  ;;  %v1933_v48 = vld [vmem:[%s2768_s8 + $0x8] sm:$0xff]  ;;  %s2002_s25 = smov 56  }
  0x14   : > { %s1822_s24 = sshll.u32 %s2780_s17, 3  ;;  %v1932_v58 = vld [vmem:[%s2768_s8] sm:$0xff] }
  0x15   : > { %1937 = vmatpush.bf16.msra.mxu3 %v1926_v2  ;;  %s2119_s26 = scalar_lea.vmem %s2761_s1, %s1822_s24  ;;  %617 = vmatpush.bf16.msra.mxu0 %v1926_v2 }
  0x16   : > { %735 = vmatpush.bf16.msra.mxu1 %v1928_v3  ;;  %v552_v4 = vld [vmem:[%s2119_s26 + $0x60] sm:$0xff]  ;;  %v553_v5 = vld [vmem:[%s2119_s26 + $0x68] sm:$0xff]  ;;  %v554_v10 = vld [vmem:[%s2119_s26 + $0x70] sm:$0xff]  ;;  %v2167_v34 = vstv %s564_s0  ;;  %s2000_s0 = smov 32  }
  0x17   : > { %v540_v6 = vld [vmem:[%s2119_s26] sm:$0xff]  ;;  %v562_v7 = vpack.c.bf16 %v553_v5, %v552_v4  ;;  %v541_v8 = vld [vmem:[%s2119_s26 + $0x8] sm:$0xff]  ;;  %v555_v11 = vld [vmem:[%s2119_s26 + $0x78] sm:$0xff]  ;;  %885 = vmatpush.bf16.msra.mxu2 %v1930_v29 }
  0x18   : > { %v556_v9 = vpack.c.bf16 %v541_v8, %v540_v6  ;;  %v542_v12 = vld [vmem:[%s2119_s26 + $0x10] sm:$0xff]  ;;  %v543_v13 = vld [vmem:[%s2119_s26 + $0x18] sm:$0xff]  ;;  %v563_v14 = vpack.c.bf16 %v555_v11, %v554_v10  ;;  %v544_v16 = vld [vmem:[%s2119_s26 + $0x20] sm:$0xff] }
  0x19   : > { %1938 = vmatpush.bf16.msrb.mxu3 %v1929_v1  ;;  %v557_v15 = vpack.c.bf16 %v543_v13, %v542_v12  ;;  %v545_v17 = vld [vmem:[%s2119_s26 + $0x28] sm:$0xff]  ;;  %v546_v19 = vld [vmem:[%s2119_s26 + $0x30] sm:$0xff]  ;;  %v547_v20 = vld [vmem:[%s2119_s26 + $0x38] sm:$0xff] }
  0x1a   : > { %1839 = vmatmul.msk.bf16.vlgmr.msra.gmra.mxu3 %vm585_vm0, %v562_v7  ;;  %1849 = vmatmul.msk.bf16.vlgmr.msra.gmra.mxu1 %vm585_vm0, %v556_v9  ;;  %v558_v18 = vpack.c.bf16 %v545_v17, %v544_v16  ;;  %v559_v21 = vpack.c.bf16 %v547_v20, %v546_v19  ;;  %v548_v22 = vld [vmem:[%s2119_s26 + $0x40] sm:$0xff]  ;;  %v549_v23 = vld [vmem:[%s2119_s26 + $0x48] sm:$0xff]  ;;  %v550_v25 = vld [vmem:[%s2119_s26 + $0x50] sm:$0xff] }
  0x1b   : > { %1833 = vmatmul.msk.bf16.vlgmr.msra.gmra.mxu0 %vm585_vm0, %v556_v9  ;;  %v560_v24 = vpack.c.bf16 %v549_v23, %v548_v22  ;;  %v551_v26 = vld [vmem:[%s2119_s26 + $0x58] sm:$0xff] }
  0x1c   : > { %v561_v27 = vpack.c.bf16 %v551_v26, %v550_v25 }
  0x1d   : > { %1939 = vmatpush.bf16.msrb.mxu3 %v1928_v3 }
  0x21   : > { %1940 = vmatpush.bf16.msra.mxu3 %v1931_v28 }
  0x25   : > { %1941 = vmatpush.bf16.msra.mxu3 %v1930_v29 }
  0x2a   : > { %1840 = vmatmul.msk.bf16.gmra.mxu3 %vm585_vm0, %v563_v14  ;;  %1850 = vmatmul.msk.bf16.gmra.mxu1 %vm585_vm0, %v557_v15 }
  0x2b   : > { %1834 = vmatmul.msk.bf16.gmra.mxu0 %vm585_vm0, %v557_v15 }
  0x3a   : > { %1855 = vmatmul.msk.bf16.vlgmr.msrb.gmra.mxu3 %vm585_vm0, %v562_v7  ;;  %1851 = vmatmul.msk.bf16.gmra.mxu1 %vm585_vm0, %v558_v18 }
  0x3b   : > { %1835 = vmatmul.msk.bf16.gmra.mxu0 %vm585_vm0, %v558_v18  ;;  %1002 = vmatpush.bf16.msrb.mxu3 %v1933_v48 }
  0x3f   : > { %1003 = vmatpush.bf16.msrb.mxu3 %v1932_v58 }
  0x4a   : > { %1856 = vmatmul.msk.bf16.gmra.mxu3 %vm585_vm0, %v563_v14  ;;  %1852 = vmatmul.msk.bf16.gmra.mxu1 %vm585_vm0, %v559_v21 }
  0x4b   : > { %1836 = vmatmul.msk.bf16.gmra.mxu0 %vm585_vm0, %v559_v21 }
  0x5a   : > { %1853 = vmatmul.msk.bf16.gmra.mxu1 %vm585_vm0, %v560_v24 }
  0x5b   : > { %1837 = vmatmul.msk.bf16.gmra.mxu0 %vm585_vm0, %v560_v24 }
  0x6a   : > { %1854 = vmatmul.msk.bf16.gmra.mxu1 %vm585_vm0, %v561_v27 }
  0x6b   : > { %1838 = vmatmul.msk.bf16.gmra.mxu0 %vm585_vm0, %v561_v27 }
  0x97   : > { %v737_v31 = vpop.f32.mrf.mxu1 }
  0x98   : > { %v738_v32 = vadd.f32 %v2162_v30, %v737_v31 }
  0x9a   : > { %v793_v35 = vmul.f32 %v738_v32, %v2167_v34  ;;  %vm777_vm1 = vcmp.ge.f32.partialorder %v738_v32, 0.0 }
  0x9c   : > { %v809_v39 = vsel %vm777_vm1, %v738_v32, %v793_v35 }
  0x9d   : > { %v2165_v33 = vpop.f32.mrf.mxu3 }
  0x9f   : > { %v739_v36 = vpop.f32.mrf.mxu1 }
  0xa0   : > { %v740_v37 = vadd.f32 %v2162_v30, %v739_v36 }
  0xa2   : > { %vm778_vm2 = vcmp.ge.f32.partialorder %v740_v37, 0.0  ;;  %v794_v38 = vmul.f32 %v740_v37, %v2167_v34 }
  0xa4   : > { %v810_v41 = vsel %vm778_vm2, %v740_v37, %v794_v38 }
  0xa5   : > { %v2172_v40 = vpop.f32.mrf.mxu3  ;;  %v2174_v42 = vpack.c.bf16 %v810_v41, %v809_v39 }
  0xa7   : > { %v742_v43 = vpop.f32.mrf.mxu1  ;;  %1866 = vmatmul.msk.bf16.vlgmr.msra.gmra.mxu2 %vm585_vm0, %v2174_v42 }
  0xa8   : > { %v743_v44 = vadd.f32 %v2162_v30, %v742_v43 }
  0xaa   : > { %v795_v46 = vmul.f32 %v743_v44, %v2167_v34  ;;  %vm779_vm3 = vcmp.ge.f32.partialorder %v743_v44, 0.0 }
  0xac   : > { %v811_v51 = vsel %vm779_vm3, %v743_v44, %v795_v46 }
  0xad   : > { %v2179_v45 = vpop.f32.mrf.mxu3 }
  0xaf   : > { %v744_v47 = vpop.f32.mrf.mxu1 }
  0xb0   : > { %v745_v49 = vadd.f32 %v2162_v30, %v744_v47 }
  0xb2   : > { %vm780_vm4 = vcmp.ge.f32.partialorder %v745_v49, 0.0  ;;  %v796_v50 = vmul.f32 %v745_v49, %v2167_v34 }
  0xb4   : > { %v812_v53 = vsel %vm780_vm4, %v745_v49, %v796_v50 }
  0xb5   : > { %v2187_v52 = vpop.f32.mrf.mxu3  ;;  %v2189_v54 = vpack.c.bf16 %v812_v53, %v811_v51  ;;  %v2244_v53 = vld [vmem:[%s2767_s7] ss:$0 sm:$0xff] }
  0xb7   : > { %v747_v55 = vpop.f32.mrf.mxu1  ;;  %1867 = vmatmul.msk.bf16.gmra.mxu2 %vm585_vm0, %v2189_v54 }
  0xb8   : > { %v748_v56 = vadd.f32 %v2162_v30, %v747_v55 }
  0xba   : > { %v797_v59 = vmul.f32 %v748_v56, %v2167_v34  ;;  %vm781_vm5 = vcmp.ge.f32.partialorder %v748_v56, 0.0 }
  0xbc   : > { %v813_v0 = vsel %vm781_vm5, %v748_v56, %v797_v59 }
  0xbd   : > { %v767_v57 = vpop.f32.mrf.mxu3 }
  0xbe   : > { %v768_v62 = vadd.f32 %v2162_v30, %v767_v57 }
  0xbf   : > { %v749_v60 = vpop.f32.mrf.mxu1 }
  0xc0   : > { %v750_v61 = vadd.f32 %v2162_v30, %v749_v60  ;;  %v805_v3 = vmul.f32 %v768_v62, %v2167_v34  ;;  %vm789_vm7 = vcmp.ge.f32.partialorder %v768_v62, 0.0 }
  0xc2   : > { %vm782_vm6 = vcmp.ge.f32.partialorder %v750_v61, 0.0  ;;  %v798_v63 = vmul.f32 %v750_v61, %v2167_v34  ;;  %v821_v8 = vsel %vm789_vm7, %v768_v62, %v805_v3 }
  0xc4   : > { %v814_v2 = vsel %vm782_vm6, %v750_v61, %v798_v63 }
  0xc5   : > { %v769_v1 = vpop.f32.mrf.mxu3  ;;  %v827_v5 = vpack.c.bf16 %v814_v2, %v813_v0 }
  0xc6   : > { %v770_v4 = vadd.f32 %v2162_v30, %v769_v1 }
  0xc7   : > { %v752_v7 = vpop.f32.mrf.mxu1  ;;  %1868 = vmatmul.msk.bf16.gmra.mxu2 %vm585_vm0, %v827_v5 }
  0xc8   : > { %vm790_vm8 = vcmp.ge.f32.partialorder %v770_v4, 0.0  ;;  %v806_v6 = vmul.f32 %v770_v4, %v2167_v34  ;;  %v753_v11 = vadd.f32 %v2162_v30, %v752_v7 }
  0xca   : > { %v822_v9 = vsel %vm790_vm8, %v770_v4, %v806_v6  ;;  %v799_v13 = vmul.f32 %v753_v11, %v2167_v34  ;;  %vm783_vm9 = vcmp.ge.f32.partialorder %v753_v11, 0.0 }
  0xcb   : > { %v2205_v10 = vpack.c.bf16 %v822_v9, %v821_v8 }
  0xcc   : > { %v815_v18 = vsel %vm783_vm9, %v753_v11, %v799_v13 }
  0xcd   : > { %v772_v12 = vpop.f32.mrf.mxu3  ;;  %1872 = vmatmul.msk.bf16.vlgmr.msra.gmra.mxu3 %vm585_vm0, %v2205_v10 }
  0xce   : > { %v773_v16 = vadd.f32 %v2162_v30, %v772_v12 }
  0xcf   : > { %v754_v14 = vpop.f32.mrf.mxu1 }
  0xd0   : > { %v755_v15 = vadd.f32 %v2162_v30, %v754_v14  ;;  %v807_v21 = vmul.f32 %v773_v16, %v2167_v34  ;;  %vm791_vm11 = vcmp.ge.f32.partialorder %v773_v16, 0.0 }
  0xd2   : > { %vm784_vm10 = vcmp.ge.f32.partialorder %v755_v15, 0.0  ;;  %v800_v17 = vmul.f32 %v755_v15, %v2167_v34  ;;  %v823_v25 = vsel %vm791_vm11, %v773_v16, %v807_v21 }
  0xd4   : > { %v816_v20 = vsel %vm784_vm10, %v755_v15, %v800_v17 }
  0xd5   : > { %v774_v19 = vpop.f32.mrf.mxu3  ;;  %v828_v23 = vpack.c.bf16 %v816_v20, %v815_v18 }
  0xd6   : > { %v775_v22 = vadd.f32 %v2162_v30, %v774_v19 }
  0xd7   : > { %1869 = vmatmul.msk.bf16.gmra.mxu2 %vm585_vm0, %v828_v23  ;;  %v757_v28 = vpop.f32.mrf.mxu1 }
  0xd8   : > { %vm792_vm12 = vcmp.ge.f32.partialorder %v775_v22, 0.0  ;;  %v808_v24 = vmul.f32 %v775_v22, %v2167_v34  ;;  %v758_v29 = vadd.f32 %v2162_v30, %v757_v28 }
  0xda   : > { %v824_v26 = vsel %vm792_vm12, %v775_v22, %v808_v24  ;;  %v801_v31 = vmul.f32 %v758_v29, %v2167_v34  ;;  %vm785_vm13 = vcmp.ge.f32.partialorder %v758_v29, 0.0  ;;  %v1934_v22 = vld [vmem:[%s2770_s10] sm:$0xff] }
  0xdb   : > { %v2218_v27 = vpack.c.bf16 %v824_v26, %v823_v25  ;;  %1146 = vmatpush.bf16.msrb.mxu0 %v1934_v22 }
  0xdc   : > { %v817_v37 = vsel %vm785_vm13, %v758_v29, %v801_v31 }
  0xdd   : > { %1873 = vmatmul.msk.bf16.gmra.mxu3 %vm585_vm0, %v2218_v27 }
  0xdf   : > { %v759_v32 = vpop.f32.mrf.mxu1 }
  0xe0   : > { %v760_v35 = vadd.f32 %v2162_v30, %v759_v32 }
  0xe2   : > { %vm786_vm14 = vcmp.ge.f32.partialorder %v760_v35, 0.0  ;;  %v802_v36 = vmul.f32 %v760_v35, %v2167_v34 }
  0xe4   : > { %v818_v38 = vsel %vm786_vm14, %v760_v35, %v802_v36 }
  0xe5   : > { %v829_v39 = vpack.c.bf16 %v818_v38, %v817_v37 }
  0xe7   : > { %v762_v41 = vpop.f32.mrf.mxu1  ;;  %1870 = vmatmul.msk.bf16.gmra.mxu2 %vm585_vm0, %v829_v39 }
  0xe8   : > { %v763_v43 = vadd.f32 %v2162_v30, %v762_v41 }
  0xea   : > { %v803_v44 = vmul.f32 %v763_v43, %v2167_v34  ;;  %vm787_vm15 = vcmp.ge.f32.partialorder %v763_v43, 0.0 }
  0xec   : > { %v819_v49 = vsel %vm787_vm15, %v763_v43, %v803_v44 }
  0xed   : > { %1882 = vmatmul.msk.bf16.vlgmr.msrb.gmra.mxu3 %vm585_vm0, %v2174_v42  ;;  %v1935_v42 = vld [vmem:[%s2772_s12] sm:$0xff] }
  0xee   : > { %1256 = vmatpush.bf16.msrb.mxu1 %v1935_v42 }
  0xef   : > { %v764_v46 = vpop.f32.mrf.mxu1 }
  0xf0   : > { %v765_v47 = vadd.f32 %v2162_v30, %v764_v46 }
  0xf2   : > { %vm788_vm1 = vcmp.ge.f32.partialorder %v765_v47, 0.0  ;;  %v804_v48 = vmul.f32 %v765_v47, %v2167_v34 }
  0xf4   : > { %v820_v50 = vsel %vm788_vm1, %v765_v47, %v804_v48  ;;  %vm1114_vm1 = vcmask 130048  }
  0xf5   : > { %v830_v51 = vpack.c.bf16 %v820_v50, %v819_v49 }
  0xf7   : > { %1871 = vmatmul.msk.bf16.gmra.mxu2 %vm585_vm0, %v830_v51 }
  0xfd   : > { %1883 = vmatmul.msk.bf16.gmra.mxu3 %vm585_vm0, %v2189_v54  ;;  %v2246_v54 = vstv %s1857_s28  ;;  %s1890_s28 = sld [smem:[#allocation2 + $0x2]] }
 0x10d   : > { %1884 = vmatmul.msk.bf16.gmra.mxu3 %vm585_vm0, %v827_v5 }
 0x11d   : > { %1885 = vmatmul.msk.bf16.gmra.mxu3 %vm585_vm0, %v828_v23 }
 0x12a   : > { %v887_v30 = vpop.f32.mrf.mxu2 }
 0x12b   : > { %v888_v55 = vadd.f32 %v2244_v53, %v887_v30 }
 0x12d   : > { %1886 = vmatmul.msk.bf16.gmra.mxu3 %vm585_vm0, %v829_v39  ;;  %vm927_vm2 = vcmp.ge.f32.partialorder %v888_v55, 0.0  ;;  %v944_v56 = vmul.f32 %v2246_v54, %v888_v55  ;;  %v2293_v39 = vld [vmem:[%s2769_s9] ss:$0 sm:$0xff] }
 0x12f   : > { %v960_v57 = vsel %vm927_vm2, %v888_v55, %v944_v56 }
 0x130   : > { %1503 = vrot.lane.b32.xlu0 %v960_v57, %s2000_s0 }
 0x132   : > { %v889_v58 = vpop.f32.mrf.mxu2 }
 0x133   : > { %v890_v59 = vadd.f32 %v2244_v53, %v889_v58 }
 0x135   : > { %vm928_vm3 = vcmp.ge.f32.partialorder %v890_v59, 0.0  ;;  %v945_v60 = vmul.f32 %v2246_v54, %v890_v59 }
 0x137   : > { %v961_v61 = vsel %vm928_vm3, %v890_v59, %v945_v60 }
 0x138   : > { %1505 = vrot.lane.b32.xlu0 %v961_v61, %s2000_s0 }
 0x13a   : > { %v892_v62 = vpop.f32.mrf.mxu2 }
 0x13b   : > { %v893_v63 = vadd.f32 %v2244_v53, %v892_v62 }
 0x13d   : > { %1887 = vmatmul.msk.bf16.gmra.mxu3 %vm585_vm0, %v830_v51  ;;  %vm929_vm4 = vcmp.ge.f32.partialorder %v893_v63, 0.0  ;;  %v946_v0 = vmul.f32 %v2246_v54, %v893_v63 }
 0x13f   : > { %v962_v1 = vsel %vm929_vm4, %v893_v63, %v946_v0  ;;  %v2308_v63 = vpop.f32.mrf.mxu0 }
 0x140   : > { %1507 = vrot.lane.b32.xlu1 %v962_v1, %s2000_s0 }
 0x142   : > { %v894_v2 = vpop.f32.mrf.mxu2 }
 0x143   : > { %v895_v3 = vadd.f32 %v2244_v53, %v894_v2 }
 0x145   : > { %vm930_vm5 = vcmp.ge.f32.partialorder %v895_v3, 0.0  ;;  %v947_v4 = vmul.f32 %v2246_v54, %v895_v3 }
 0x147   : > { %v963_v5 = vsel %vm930_vm5, %v895_v3, %v947_v4 }
 0x148   : > { %1509 = vrot.lane.b32.xlu1 %v963_v5, %s2000_s0 }
 0x14a   : > { %v897_v6 = vpop.f32.mrf.mxu2 }
 0x14b   : > { %v898_v7 = vadd.f32 %v2244_v53, %v897_v6 }
 0x14d   : > { %1888 = vmatmul.msk.bf16.gmra.mxu3 %vm585_vm0, %v2205_v10  ;;  %vm931_vm6 = vcmp.ge.f32.partialorder %v898_v7, 0.0  ;;  %v948_v8 = vmul.f32 %v2246_v54, %v898_v7 }
 0x14f   : > { %v964_v11 = vsel %vm931_vm6, %v898_v7, %v948_v8  ;;  %v1354_v8 = vld [vmem:[%s2774_s14] sm:$0xf]  ;;  %vm1384_vm6 = vcmask 1043456  }
 0x150   : > { %v917_v9 = vpop.f32.mrf.mxu3  ;;  %1511 = vrot.lane.b32.xlu2 %v964_v11, %s2000_s0 }
 0x151   : > { %v918_v12 = vadd.f32 %v2244_v53, %v917_v9  ;;  %v1386_v9 = vsel %vm1384_vm6, %v1354_v8, 0 }
 0x152   : > { %v899_v14 = vpop.f32.mrf.mxu2  ;;  %1395 = vmatpush.bf16.msrb.mxu2 %v1386_v9 }
 0x153   : > { %v956_v13 = vmul.f32 %v2246_v54, %v918_v12  ;;  %vm939_vm7 = vcmp.ge.f32.partialorder %v918_v12, 0.0  ;;  %v900_v15 = vadd.f32 %v2244_v53, %v899_v14  ;;  %v2319_v14 = vpop.f32.mrf.mxu0 }
 0x155   : > { %v972_v16 = vsel %vm939_vm7, %v918_v12, %v956_v13  ;;  %v949_v10 = vmul.f32 %v2246_v54, %v900_v15  ;;  %vm932_vm8 = vcmp.ge.f32.partialorder %v900_v15, 0.0 }
 0x156   : > { %1527 = vrot.lane.b32.xlu0 %v972_v16, %s2000_s0 }
 0x157   : > { %v965_v18 = vsel %vm932_vm8, %v900_v15, %v949_v10 }
 0x158   : > { %v919_v17 = vpop.f32.mrf.mxu3  ;;  %1513 = vrot.lane.b32.xlu2 %v965_v18, %s2000_s0 }
 0x159   : > { %v920_v19 = vadd.f32 %v2244_v53, %v919_v17 }
 0x15a   : > { %v902_v21 = vpop.f32.mrf.mxu2 }
 0x15b   : > { %v957_v20 = vmul.f32 %v2246_v54, %v920_v19  ;;  %vm940_vm9 = vcmp.ge.f32.partialorder %v920_v19, 0.0  ;;  %v903_v23 = vadd.f32 %v2244_v53, %v902_v21 }
 0x15d   : > { %1889 = vmatmul.msk.bf16.gmra.mxu3 %vm585_vm0, %v2218_v27  ;;  %v973_v24 = vsel %vm940_vm9, %v920_v19, %v957_v20  ;;  %v950_v25 = vmul.f32 %v2246_v54, %v903_v23  ;;  %vm933_vm10 = vcmp.ge.f32.partialorder %v903_v23, 0.0 }
 0x15e   : > { %1529 = vrot.lane.b32.xlu1 %v973_v24, %s2000_s0  ;;  %v624_v24 = vpop.f32.mrf.mxu0 }
 0x15f   : > { %v966_v28 = vsel %vm933_vm10, %v903_v23, %v950_v25 }
 0x160   : > { %v922_v26 = vpop.f32.mrf.mxu3  ;;  %1515 = vrot.lane.b32.xlu0 %v966_v28, %s2000_s0 }
 0x161   : > { %v923_v29 = vadd.f32 %v2244_v53, %v922_v26 }
 0x162   : > { %v904_v41 = vpop.f32.mrf.mxu2 }
 0x163   : > { %v958_v31 = vmul.f32 %v2246_v54, %v923_v29  ;;  %vm941_vm11 = vcmp.ge.f32.partialorder %v923_v29, 0.0  ;;  %v905_v43 = vadd.f32 %v2244_v53, %v904_v41 }
 0x165   : > { %v974_v32 = vsel %vm941_vm11, %v923_v29, %v958_v31  ;;  %v951_v42 = vmul.f32 %v2246_v54, %v905_v43  ;;  %vm934_vm13 = vcmp.ge.f32.partialorder %v905_v43, 0.0 }
 0x166   : > { %1531 = vrot.lane.b32.xlu2 %v974_v32, %s2000_s0 }
 0x167   : > { %v967_v49 = vsel %vm934_vm13, %v905_v43, %v951_v42 }
 0x168   : > { %v924_v27 = vpop.f32.mrf.mxu3  ;;  %1517 = vrot.lane.b32.xlu1 %v967_v49, %s2000_s0 }
 0x169   : > { %v925_v35 = vadd.f32 %v2244_v53, %v924_v27  ;;  %v2335_v27 = vpop.f32.mrf.mxu0 }
 0x16a   : > { %v907_v51 = vpop.f32.mrf.mxu2 }
 0x16b   : > { %v959_v36 = vmul.f32 %v2246_v54, %v925_v35  ;;  %vm942_vm12 = vcmp.ge.f32.partialorder %v925_v35, 0.0  ;;  %v908_v58 = vadd.f32 %v2244_v53, %v907_v51 }
 0x16d   : > { %v975_v37 = vsel %vm942_vm12, %v925_v35, %v959_v36  ;;  %v952_v62 = vmul.f32 %v2246_v54, %v908_v58  ;;  %vm935_vm2 = vcmp.ge.f32.partialorder %v908_v58, 0.0  ;;  %v2341_v36 = vld [vmem:[%s2763_s3] ss:$0 sm:$0xff] }
 0x16e   : > { %1533 = vrot.lane.b32.xlu0 %v975_v37, %s2000_s0  ;;  %v625_v43 = vadd.f32 %v2341_v36, %v624_v24 }
 0x16f   : > { %v968_v4 = vsel %vm935_vm2, %v908_v58, %v952_v62 }
 0x170   : > { %v1005_v38 = vpop.f32.mrf.mxu3  ;;  %1519 = vrot.lane.b32.xlu2 %v968_v4, %s2000_s0  ;;  %vm661_vm13 = vcmp.ge.f32.partialorder %v625_v43, 0.0 }
 0x171   : > { %v1006_v44 = vadd.f32 %v2293_v39, %v1005_v38  ;;  %v629_v49 = vpop.f32.mrf.mxu0 }
 0x172   : > { %v909_v59 = vpop.f32.mrf.mxu2 }
 0x173   : > { %v1061_v47 = vmul.f32 %v1006_v44, %v2246_v54  ;;  %vm1045_vm14 = vcmp.ge.f32.partialorder %v1006_v44, 0.0  ;;  %v910_v60 = vadd.f32 %v2244_v53, %v909_v59 }
 0x175   : > { %v1077_v30 = vsel %vm1045_vm14, %v1006_v44, %v1061_v47  ;;  %v953_v0 = vmul.f32 %v2246_v54, %v910_v60  ;;  %vm936_vm3 = vcmp.ge.f32.partialorder %v910_v60, 0.0 }
 0x177   : > { %v969_v5 = vsel %vm936_vm3, %v910_v60, %v953_v0 }
 0x178   : > { %v1007_v46 = vpop.f32.mrf.mxu3  ;;  %1521 = vrot.lane.b32.xlu0 %v969_v5, %s2000_s0 }
 0x179   : > { %v1008_v48 = vadd.f32 %v2293_v39, %v1007_v46  ;;  %v678_v46 = vmul.f32 %v2167_v34, %v625_v43  ;;  %v631_v60 = vpop.f32.mrf.mxu0 }
 0x17a   : > { %v912_v7 = vpop.f32.mrf.mxu2  ;;  %v632_v4 = vadd.f32 %v2341_v36, %v631_v60 }
 0x17b   : > { %vm1046_vm15 = vcmp.ge.f32.partialorder %v1008_v48, 0.0  ;;  %v1062_v50 = vmul.f32 %v1008_v48, %v2246_v54  ;;  %v913_v16 = vadd.f32 %v2244_v53, %v912_v7 }
 0x17d   : > { %v1078_v55 = vsel %vm1046_vm15, %v1008_v48, %v1062_v50  ;;  %v954_v19 = vmul.f32 %v2246_v54, %v913_v16  ;;  %vm937_vm8 = vcmp.ge.f32.partialorder %v913_v16, 0.0 }
 0x17e   : > { %v1093_v56 = vpack.c.bf16 %v1078_v55, %v1077_v30  ;;  %v694_v30 = vsel %vm661_vm13, %v625_v43, %v678_v46 }
 0x17f   : > { %v970_v26 = vsel %vm937_vm8, %v913_v16, %v954_v19 }
 0x180   : > { %v1010_v57 = vpop.f32.mrf.mxu3  ;;  %1895 = vmatmul.msk.bf16.vlgmr.msrb.gmra.mxu0 %vm1114_vm1, %v1093_v56  ;;  %1907 = vmatmul.msk.bf16.vlgmr.msrb.gmra.mxu1 %vm1114_vm1, %v1093_v56 }
 0x181   : > { %v1011_v61 = vadd.f32 %v2293_v39, %v1010_v57  ;;  %1523 = vrot.lane.b32.xlu1 %v970_v26, %s2000_s0 }
 0x182   : > { %v914_v10 = vpop.f32.mrf.mxu2 }
 0x183   : > { %v1063_v2 = vmul.f32 %v1011_v61, %v2246_v54  ;;  %vm1047_vm4 = vcmp.ge.f32.partialorder %v1011_v61, 0.0  ;;  %v915_v17 = vadd.f32 %v2244_v53, %v914_v10 }
 0x185   : > { %v1079_v11 = vsel %vm1047_vm4, %v1011_v61, %v1063_v2  ;;  %v955_v20 = vmul.f32 %v2246_v54, %v915_v17  ;;  %vm938_vm7 = vcmp.ge.f32.partialorder %v915_v17, 0.0  ;;  %v655_v61 = vadd.f32 %v2341_v36, %v2179_v45 }
 0x186   : > { %vm664_vm4 = vcmp.ge.f32.partialorder %v632_v4, 0.0 }
 0x187   : > { %v971_v25 = vsel %vm938_vm7, %v915_v17, %v955_v20  ;;  %v690_v5 = vmul.f32 %v2167_v34, %v655_v61  ;;  %vm673_vm2 = vcmp.ge.f32.partialorder %v655_v61, 0.0  ;;  %v634_v17 = vpop.f32.mrf.mxu0 }
 0x188   : > { %v1012_v1 = vpop.f32.mrf.mxu3  ;;  %1525 = vrot.lane.b32.xlu2 %v971_v25, %s2000_s0 }
 0x189   : > { %v1013_v3 = vadd.f32 %v2293_v39, %v1012_v1 }
 0x18b   : > { %vm1048_vm5 = vcmp.ge.f32.partialorder %v1013_v3, 0.0  ;;  %v1064_v6 = vmul.f32 %v1013_v3, %v2246_v54 }
 0x18d   : > { %v1080_v12 = vsel %vm1048_vm5, %v1013_v3, %v1064_v6  ;;  %v630_v3 = vadd.f32 %v2341_v36, %v629_v49 }
 0x18e   : > { %v1094_v13 = vpack.c.bf16 %v1080_v12, %v1079_v11  ;;  %v681_v11 = vmul.f32 %v2167_v34, %v632_v4  ;;  %v650_v12 = vadd.f32 %v2341_v36, %v2165_v33 }
 0x18f   : > { %v680_v9 = vmul.f32 %v2167_v34, %v630_v3  ;;  %vm663_vm3 = vcmp.ge.f32.partialorder %v630_v3, 0.0 }
 0x190   : > { %v1015_v15 = vpop.f32.mrf.mxu3  ;;  %1896 = vmatmul.msk.bf16.gmra.mxu0 %vm1114_vm1, %v1094_v13  ;;  %1908 = vmatmul.msk.bf16.gmra.mxu1 %vm1114_vm1, %v1094_v13  ;;  %v697_v19 = vsel %vm664_vm4, %v632_v4, %v681_v11  ;;  %v688_v20 = vmul.f32 %v2167_v34, %v650_v12  ;;  %vm671_vm5 = vcmp.ge.f32.partialorder %v650_v12, 0.0  ;;  %vm1359_vm4 = vcmask 64512  }
 0x191   : > { %v1016_v18 = vadd.f32 %v2293_v39, %v1015_v15  ;;  %v706_v15 = vsel %vm673_vm2, %v655_v61, %v690_v5 }
 0x192   : > { %v704_v24 = vsel %vm671_vm5, %v650_v12, %v688_v20 }
 0x193   : > { %v1065_v22 = vmul.f32 %v1016_v18, %v2246_v54  ;;  %vm1049_vm9 = vcmp.ge.f32.partialorder %v1016_v18, 0.0 }
 0x195   : > { %v1081_v28 = vsel %vm1049_vm9, %v1016_v18, %v1065_v22  ;;  %v696_v18 = vsel %vm663_vm3, %v630_v3, %v680_v9 }
 0x198   : > { %v1017_v21 = vpop.f32.mrf.mxu3 }
 0x199   : > { %v1018_v23 = vadd.f32 %v2293_v39, %v1017_v21 }
 0x19b   : > { %vm1050_vm10 = vcmp.ge.f32.partialorder %v1018_v23, 0.0  ;;  %v1066_v53 = vmul.f32 %v1018_v23, %v2246_v54 }
 0x19d   : > { %v1082_v29 = vsel %vm1050_vm10, %v1018_v23, %v1066_v53 }
 0x19e   : > { %v1095_v31 = vpack.c.bf16 %v1082_v29, %v1081_v28  ;;  %v635_v29 = vadd.f32 %v2341_v36, %v634_v17 }
 0x1a0   : > { %v1020_v32 = vpop.f32.mrf.mxu3  ;;  %1897 = vmatmul.msk.bf16.gmra.mxu0 %vm1114_vm1, %v1095_v31  ;;  %1909 = vmatmul.msk.bf16.gmra.mxu1 %vm1114_vm1, %v1095_v31  ;;  %vm665_vm8 = vcmp.ge.f32.partialorder %v635_v29, 0.0 }
 0x1a1   : > { %v1021_v35 = vadd.f32 %v2293_v39, %v1020_v32  ;;  %v636_v32 = vpop.f32.mrf.mxu0 }
 0x1a2   : > { %v2350_v56 = vpop.permute.xlu0 %1503 }
 0x1a3   : > { %v1067_v38 = vmul.f32 %v1021_v35, %v2246_v54  ;;  %vm1051_vm11 = vcmp.ge.f32.partialorder %v1021_v35, 0.0 }
 0x1a5   : > { %v1083_v47 = vsel %vm1051_vm11, %v1021_v35, %v1067_v38  ;;  %v682_v35 = vmul.f32 %v2167_v34, %v635_v29 }
 0x1a8   : > { %v1022_v37 = vpop.f32.mrf.mxu3 }
 0x1a9   : > { %v1023_v41 = vadd.f32 %v2293_v39, %v1022_v37 }
 0x1aa   : > { %v1512_v42 = vpop.permute.xlu2 %1511  ;;  %v2364_v45 = vpop.permute.xlu0 %1505 }
 0x1ab   : > { %vm1052_vm12 = vcmp.ge.f32.partialorder %v1023_v41, 0.0  ;;  %v1068_v44 = vmul.f32 %v1023_v41, %v2246_v54  ;;  %v2378_v21 = vsel %vm585_vm0, %v696_v18, %v1512_v42 }
 0x1ad   : > { %v1084_v48 = vsel %vm1052_vm12, %v1023_v41, %v1068_v44  ;;  %v698_v44 = vsel %vm665_vm8, %v635_v29, %v682_v35 }
 0x1ae   : > { %v1096_v50 = vpack.c.bf16 %v1084_v48, %v1083_v47  ;;  %v639_v48 = vpop.f32.mrf.mxu0 }
 0x1b0   : > { %v1025_v51 = vpop.f32.mrf.mxu3  ;;  %1910 = vmatmul.msk.bf16.gmra.mxu1 %vm1114_vm1, %v1096_v50  ;;  %1898 = vmatmul.msk.bf16.gmra.mxu0 %vm1114_vm1, %v1096_v50 }
 0x1b1   : > { %v1026_v58 = vadd.f32 %v2293_v39, %v1025_v51 }
 0x1b2   : > { %v1508_v55 = vpop.permute.xlu1 %1507  ;;  %v1514_v59 = vpop.permute.xlu2 %1513 }
 0x1b3   : > { %v2353_v57 = vsel %vm585_vm0, %v694_v30, %v1508_v55  ;;  %v1069_v0 = vmul.f32 %v1026_v58, %v2246_v54  ;;  %vm1053_vm14 = vcmp.ge.f32.partialorder %v1026_v58, 0.0  ;;  %v2381_v22 = vsel %vm585_vm0, %v697_v19, %v1514_v59 }
 0x1b5   : > { %v1085_v6 = vsel %vm1053_vm14, %v1026_v58, %v1069_v0  ;;  %v640_v58 = vadd.f32 %v2341_v36, %v639_v48 }
 0x1b6   : > { %v2404_v0 = vpop.f32.mrf.mxu0 }
 0x1b7   : > { %vm667_vm11 = vcmp.ge.f32.partialorder %v640_v58, 0.0 }
 0x1b8   : > { %v1027_v62 = vpop.f32.mrf.mxu3 }
 0x1b9   : > { %v1028_v1 = vadd.f32 %v2293_v39, %v1027_v62  ;;  %v684_v62 = vmul.f32 %v2167_v34, %v640_v58 }
 0x1ba   : > { %v2399_v30 = vpop.permute.xlu1 %1509 }
 0x1bb   : > { %vm1054_vm15 = vcmp.ge.f32.partialorder %v1028_v1, 0.0  ;;  %v1070_v2 = vmul.f32 %v1028_v1, %v2246_v54  ;;  %v700_v3 = vsel %vm667_vm11, %v640_v58, %v684_v62 }
 0x1bd   : > { %v1086_v7 = vsel %vm1054_vm15, %v1028_v1, %v1070_v2  ;;  %v637_v2 = vadd.f32 %v2341_v36, %v636_v32 }
 0x1be   : > { %v1097_v8 = vpack.c.bf16 %v1086_v7, %v1085_v6 }
 0x1bf   : > { %vm666_vm12 = vcmp.ge.f32.partialorder %v637_v2, 0.0 }
 0x1c0   : > { %v1030_v13 = vpop.f32.mrf.mxu3  ;;  %1911 = vmatmul.msk.bf16.gmra.mxu1 %vm1114_vm1, %v1097_v8  ;;  %v1532_v16 = vpop.permute.xlu2 %1531  ;;  %1899 = vmatmul.msk.bf16.gmra.mxu0 %vm1114_vm1, %v1097_v8  ;;  %v683_v8 = vmul.f32 %v2167_v34, %v637_v2 }
 0x1c1   : > { %v2373_v10 = vsel %vm585_vm0, %v706_v15, %v1532_v16  ;;  %v1031_v33 = vadd.f32 %v2293_v39, %v1030_v13  ;;  %v2418_v13 = vpop.f32.mrf.mxu0 }
 0x1c2   : > { %v699_v16 = vsel %vm666_vm12, %v637_v2, %v683_v8 }
 0x1c3   : > { %v1071_v26 = vmul.f32 %v1031_v33, %v2246_v54  ;;  %vm1055_vm6 = vcmp.ge.f32.partialorder %v1031_v33, 0.0 }
 0x1c5   : > { %v1087_v37 = vsel %vm1055_vm6, %v1031_v33, %v1071_v26 }
 0x1c8   : > { %v1032_v23 = vpop.f32.mrf.mxu3  ;;  %v1528_v25 = vpop.permute.xlu0 %1527 }
 0x1c9   : > { %v1033_v53 = vadd.f32 %v2293_v39, %v1032_v23  ;;  %v2386_v28 = vsel %vm585_vm0, %v704_v24, %v1528_v25  ;;  %v2426_v23 = vpop.f32.mrf.mxu0  ;;  %v2433_v24 = vstv %s1890_s28  ;;  %s2658_s28 = scalar_lea.vmem %s2776_s16, %s1822_s24 }
 0x1ca   : > { %v1520_v5 = vpop.permute.xlu2 %1519 }
 0x1cb   : > { %vm1056_vm7 = vcmp.ge.f32.partialorder %v1033_v53, 0.0  ;;  %v1072_v31 = vmul.f32 %v1033_v53, %v2246_v54  ;;  %v2413_v7 = vsel %vm585_vm0, %v700_v3, %v1520_v5 }
 0x1cd   : > { %v1088_v38 = vsel %vm1056_vm7, %v1033_v53, %v1072_v31  ;;  %v2439_v53 = vld [vmem:[%s2773_s13] ss:$0 sm:$0xff] }
 0x1ce   : > { %v1098_v41 = vpack.c.bf16 %v1088_v38, %v1087_v37 }
 0x1d0   : > { %v1035_v43 = vpop.f32.mrf.mxu3  ;;  %1912 = vmatmul.msk.bf16.gmra.mxu1 %vm1114_vm1, %v1098_v41  ;;  %1900 = vmatmul.msk.bf16.gmra.mxu0 %vm1114_vm1, %v1098_v41  ;;  %v2409_v4 = vpop.permute.xlu1 %1529 }
 0x1d1   : > { %v1036_v47 = vadd.f32 %v2293_v39, %v1035_v43 }
 0x1d2   : > { %v1516_v42 = vpop.permute.xlu0 %1515 }
 0x1d3   : > { %v2394_v46 = vsel %vm585_vm0, %v698_v44, %v1516_v42  ;;  %v1073_v50 = vmul.f32 %v1036_v47, %v2246_v54  ;;  %vm1057_vm9 = vcmp.ge.f32.partialorder %v1036_v47, 0.0 }
 0x1d5   : > { %v1089_v59 = vsel %vm1057_vm9, %v1036_v47, %v1073_v50 }
 0x1d8   : > { %v1037_v49 = vpop.f32.mrf.mxu3 }
 0x1d9   : > { %v1038_v51 = vadd.f32 %v2293_v39, %v1037_v49 }
 0x1da   : > { %v1518_v17 = vpop.permute.xlu1 %1517 }
 0x1db   : > { %vm1058_vm10 = vcmp.ge.f32.partialorder %v1038_v51, 0.0  ;;  %v1074_v55 = vmul.f32 %v1038_v51, %v2246_v54  ;;  %v2422_v20 = vsel %vm585_vm0, %v699_v16, %v1518_v17 }
 0x1dd   : > { %v1090_v60 = vsel %vm1058_vm10, %v1038_v51, %v1074_v55 }
 0x1de   : > { %v1099_v61 = vpack.c.bf16 %v1090_v60, %v1089_v59 }
 0x1e0   : > { %v1040_v1 = vpop.f32.mrf.mxu3  ;;  %1913 = vmatmul.msk.bf16.gmra.mxu1 %vm1114_vm1, %v1099_v61  ;;  %1901 = vmatmul.msk.bf16.gmra.mxu0 %vm1114_vm1, %v1099_v61 }
 0x1e1   : > { %v1041_v6 = vadd.f32 %v2293_v39, %v1040_v1 }
 0x1e3   : > { %v1075_v11 = vmul.f32 %v1041_v6, %v2246_v54  ;;  %vm1059_vm13 = vcmp.ge.f32.partialorder %v1041_v6, 0.0 }
 0x1e5   : > { %v1091_v18 = vsel %vm1059_vm13, %v1041_v6, %v1075_v11 }
 0x1e8   : > { %v1042_v9 = vpop.f32.mrf.mxu3 }
 0x1e9   : > { %v1043_v12 = vadd.f32 %v2293_v39, %v1042_v9  ;;  %v2431_v39 = vld [vmem:[%s2771_s11] ss:$0 sm:$0xff] }
 0x1eb   : > { %vm1060_vm14 = vcmp.ge.f32.partialorder %v1043_v12, 0.0  ;;  %v1076_v15 = vmul.f32 %v1043_v12, %v2246_v54 }
 0x1ed   : > { %v1092_v19 = vsel %vm1060_vm14, %v1043_v12, %v1076_v15 }
 0x1ee   : > { %v1100_v33 = vpack.c.bf16 %v1092_v19, %v1091_v18 }
 0x1f0   : > { %1902 = vmatmul.msk.bf16.gmra.mxu0 %vm1114_vm1, %v1100_v33  ;;  %1914 = vmatmul.msk.bf16.gmra.mxu1 %vm1114_vm1, %v1100_v33 }
 0x1fd   : > { %v1148_v54 = vpop.f32.mrf.mxu0  ;;  %v1258_v25 = vpop.f32.mrf.mxu1 }
 0x1fe   : > { %v1149_v26 = vadd.f32 %v2431_v39, %v1148_v54  ;;  %v1259_v31 = vadd.f32 %v2439_v53, %v1258_v25 }
 0x200   : > { %v1205_v29 = vmul.f32 %v2433_v24, %v1149_v26  ;;  %vm1188_vm1 = vcmp.ge.f32.partialorder %v1149_v26, 0.0  ;;  %v1314_v38 = vmul.f32 %v1259_v31, %v2433_v24  ;;  %vm1298_vm15 = vcmp.ge.f32.partialorder %v1259_v31, 0.0 }
 0x202   : > { %v1221_v32 = vsel %vm1188_vm1, %v1149_v26, %v1205_v29  ;;  %v1330_v47 = vsel %vm1298_vm15, %v1259_v31, %v1314_v38 }
 0x203   : > { %1567 = vrot.lane.b32.xlu1 %v1221_v32, %s2001_s19 }
 0x205   : > { %v1150_v35 = vpop.f32.mrf.mxu0  ;;  %v1260_v37 = vpop.f32.mrf.mxu1 }
 0x206   : > { %v1151_v41 = vadd.f32 %v2431_v39, %v1150_v35  ;;  %v1261_v43 = vadd.f32 %v2439_v53, %v1260_v37 }
 0x208   : > { %v1206_v44 = vmul.f32 %v2433_v24, %v1151_v41  ;;  %vm1299_vm2 = vcmp.ge.f32.partialorder %v1261_v43, 0.0  ;;  %v1315_v42 = vmul.f32 %v1261_v43, %v2433_v24  ;;  %vm1189_vm3 = vcmp.ge.f32.partialorder %v1151_v41, 0.0 }
 0x20a   : > { %v1331_v48 = vsel %vm1299_vm2, %v1261_v43, %v1315_v42  ;;  %v1222_v49 = vsel %vm1189_vm3, %v1151_v41, %v1206_v44 }
 0x20b   : > { %v1346_v50 = vpack.c.bf16 %v1331_v48, %v1330_v47  ;;  %1569 = vrot.lane.b32.xlu2 %v1222_v49, %s2001_s19 }
 0x20d   : > { %v1153_v51 = vpop.f32.mrf.mxu0  ;;  %v1263_v55 = vpop.f32.mrf.mxu1  ;;  %1915 = vmatmul.msk.bf16.vlgmr.msrb.gmra.mxu2 %vm1359_vm4, %v1346_v50 }
 0x20e   : > { %v1154_v58 = vadd.f32 %v2431_v39, %v1153_v51  ;;  %v1264_v60 = vadd.f32 %v2439_v53, %v1263_v55 }
 0x210   : > { %v1207_v59 = vmul.f32 %v2433_v24, %v1154_v58  ;;  %vm1190_vm5 = vcmp.ge.f32.partialorder %v1154_v58, 0.0  ;;  %v1316_v2 = vmul.f32 %v1264_v60, %v2433_v24  ;;  %vm1300_vm6 = vcmp.ge.f32.partialorder %v1264_v60, 0.0 }
 0x212   : > { %v1223_v61 = vsel %vm1190_vm5, %v1154_v58, %v1207_v59  ;;  %v1332_v11 = vsel %vm1300_vm6, %v1264_v60, %v1316_v2 }
 0x213   : > { %1571 = vrot.lane.b32.xlu0 %v1223_v61, %s2001_s19 }
 0x215   : > { %v1155_v62 = vpop.f32.mrf.mxu0  ;;  %v1265_v1 = vpop.f32.mrf.mxu1 }
 0x216   : > { %v1156_v3 = vadd.f32 %v2431_v39, %v1155_v62  ;;  %v1266_v5 = vadd.f32 %v2439_v53, %v1265_v1 }
 0x218   : > { %v1208_v6 = vmul.f32 %v2433_v24, %v1156_v3  ;;  %vm1301_vm7 = vcmp.ge.f32.partialorder %v1266_v5, 0.0  ;;  %v1317_v8 = vmul.f32 %v1266_v5, %v2433_v24  ;;  %vm1191_vm8 = vcmp.ge.f32.partialorder %v1156_v3, 0.0 }
 0x21a   : > { %v1224_v9 = vsel %vm1191_vm8, %v1156_v3, %v1208_v6  ;;  %v1333_v12 = vsel %vm1301_vm7, %v1266_v5, %v1317_v8 }
 0x21b   : > { %1573 = vrot.lane.b32.xlu1 %v1224_v9, %s2001_s19  ;;  %v1347_v15 = vpack.c.bf16 %v1333_v12, %v1332_v11 }
 0x21d   : > { %v1158_v16 = vpop.f32.mrf.mxu0  ;;  %v1268_v17 = vpop.f32.mrf.mxu1  ;;  %1916 = vmatmul.msk.bf16.gmra.mxu2 %vm1359_vm4, %v1347_v15 }
 0x21e   : > { %v1159_v18 = vadd.f32 %v2431_v39, %v1158_v16  ;;  %v1269_v33 = vadd.f32 %v2439_v53, %v1268_v17 }
 0x220   : > { %v1209_v19 = vmul.f32 %v2433_v24, %v1159_v18  ;;  %vm1192_vm9 = vcmp.ge.f32.partialorder %v1159_v18, 0.0  ;;  %v1318_v29 = vmul.f32 %v1269_v33, %v2433_v24  ;;  %vm1302_vm10 = vcmp.ge.f32.partialorder %v1269_v33, 0.0 }
 0x222   : > { %v1225_v54 = vsel %vm1192_vm9, %v1159_v18, %v1209_v19  ;;  %v1334_v41 = vsel %vm1302_vm10, %v1269_v33, %v1318_v29 }
 0x223   : > { %1575 = vrot.lane.b32.xlu2 %v1225_v54, %s2001_s19 }
 0x225   : > { %v1160_v25 = vpop.f32.mrf.mxu0  ;;  %v1270_v26 = vpop.f32.mrf.mxu1 }
 0x226   : > { %v1161_v31 = vadd.f32 %v2431_v39, %v1160_v25  ;;  %v1271_v32 = vadd.f32 %v2439_v53, %v1270_v26 }
 0x228   : > { %v1210_v35 = vmul.f32 %v2433_v24, %v1161_v31  ;;  %vm1303_vm11 = vcmp.ge.f32.partialorder %v1271_v32, 0.0  ;;  %v1319_v37 = vmul.f32 %v1271_v32, %v2433_v24  ;;  %vm1193_vm12 = vcmp.ge.f32.partialorder %v1161_v31, 0.0 }
 0x22a   : > { %v1226_v38 = vsel %vm1193_vm12, %v1161_v31, %v1210_v35  ;;  %v1335_v43 = vsel %vm1303_vm11, %v1271_v32, %v1319_v37 }
 0x22b   : > { %1577 = vrot.lane.b32.xlu0 %v1226_v38, %s2001_s19  ;;  %v1348_v44 = vpack.c.bf16 %v1335_v43, %v1334_v41 }
 0x22d   : > { %v1163_v42 = vpop.f32.mrf.mxu0  ;;  %v1273_v47 = vpop.f32.mrf.mxu1  ;;  %1917 = vmatmul.msk.bf16.gmra.mxu2 %vm1359_vm4, %v1348_v44 }
 0x22e   : > { %v1164_v48 = vadd.f32 %v2431_v39, %v1163_v42  ;;  %v1274_v50 = vadd.f32 %v2439_v53, %v1273_v47 }
 0x230   : > { %v1211_v49 = vmul.f32 %v2433_v24, %v1164_v48  ;;  %vm1194_vm13 = vcmp.ge.f32.partialorder %v1164_v48, 0.0  ;;  %v1320_v59 = vmul.f32 %v1274_v50, %v2433_v24  ;;  %vm1304_vm14 = vcmp.ge.f32.partialorder %v1274_v50, 0.0 }
 0x232   : > { %v1227_v51 = vsel %vm1194_vm13, %v1164_v48, %v1211_v49  ;;  %v1336_v3 = vsel %vm1304_vm14, %v1274_v50, %v1320_v59  ;;  %vm1695_vm13 = vcmask 392192  }
 0x233   : > { %1579 = vrot.lane.b32.xlu1 %v1227_v51, %s2001_s19 }
 0x235   : > { %v1165_v55 = vpop.f32.mrf.mxu0  ;;  %v1275_v58 = vpop.f32.mrf.mxu1 }
 0x236   : > { %v1166_v60 = vadd.f32 %v2431_v39, %v1165_v55  ;;  %v1276_v61 = vadd.f32 %v2439_v53, %v1275_v58 }
 0x238   : > { %v1212_v62 = vmul.f32 %v2433_v24, %v1166_v60  ;;  %vm1305_vm1 = vcmp.ge.f32.partialorder %v1276_v61, 0.0  ;;  %v1321_v1 = vmul.f32 %v1276_v61, %v2433_v24  ;;  %vm1195_vm15 = vcmp.ge.f32.partialorder %v1166_v60, 0.0 }
 0x23a   : > { %v1228_v2 = vsel %vm1195_vm15, %v1166_v60, %v1212_v62  ;;  %v1337_v5 = vsel %vm1305_vm1, %v1276_v61, %v1321_v1  ;;  %v622_v62 = vadd.f32 %v2341_v36, %v2319_v14 }
 0x23b   : > { %1581 = vrot.lane.b32.xlu2 %v1228_v2, %s2001_s19  ;;  %v1349_v6 = vpack.c.bf16 %v1337_v5, %v1336_v3  ;;  %v2508_v5 = vpop.permute.xlu2 %1525 }
 0x23c   : > { %vm660_vm11 = vcmp.ge.f32.partialorder %v622_v62, 0.0 }
 0x23d   : > { %v1168_v8 = vpop.f32.mrf.mxu0  ;;  %v1278_v9 = vpop.f32.mrf.mxu1  ;;  %1918 = vmatmul.msk.bf16.gmra.mxu2 %vm1359_vm4, %v1349_v6 }
 0x23e   : > { %v1169_v11 = vadd.f32 %v2431_v39, %v1168_v8  ;;  %v1279_v15 = vadd.f32 %v2439_v53, %v1278_v9  ;;  %v677_v8 = vmul.f32 %v2167_v34, %v622_v62 }
 0x240   : > { %v1213_v12 = vmul.f32 %v2433_v24, %v1169_v11  ;;  %vm1196_vm2 = vcmp.ge.f32.partialorder %v1169_v11, 0.0  ;;  %v1322_v19 = vmul.f32 %v1279_v15, %v2433_v24  ;;  %vm1306_vm3 = vcmp.ge.f32.partialorder %v1279_v15, 0.0 }
 0x242   : > { %v1229_v16 = vsel %vm1196_vm2, %v1169_v11, %v1213_v12  ;;  %v1338_v31 = vsel %vm1306_vm3, %v1279_v15, %v1322_v19  ;;  %v693_v12 = vsel %vm660_vm11, %v622_v62, %v677_v8  ;;  %v2551_v8 = vpop.permute.xlu0 %1533 }
 0x243   : > { %1583 = vrot.lane.b32.xlu0 %v1229_v16, %s2001_s19 }
 0x245   : > { %v1170_v17 = vpop.f32.mrf.mxu0  ;;  %v1280_v18 = vpop.f32.mrf.mxu1 }
 0x246   : > { %v1171_v33 = vadd.f32 %v2431_v39, %v1170_v17  ;;  %v1281_v54 = vadd.f32 %v2439_v53, %v1280_v18  ;;  %v1680_v17 = vsel %vm585_vm0, %v693_v12, %v2364_v45 }
 0x248   : > { %v1214_v25 = vmul.f32 %v2433_v24, %v1171_v33  ;;  %vm1307_vm5 = vcmp.ge.f32.partialorder %v1281_v54, 0.0  ;;  %v1323_v26 = vmul.f32 %v1281_v54, %v2433_v24  ;;  %vm1197_vm6 = vcmp.ge.f32.partialorder %v1171_v33, 0.0 }
 0x24a   : > { %v1230_v29 = vsel %vm1197_vm6, %v1171_v33, %v1214_v25  ;;  %v1339_v32 = vsel %vm1307_vm5, %v1281_v54, %v1323_v26 }
 0x24b   : > { %1585 = vrot.lane.b32.xlu1 %v1230_v29, %s2001_s19  ;;  %v1350_v35 = vpack.c.bf16 %v1339_v32, %v1338_v31 }
 0x24d   : > { %v1173_v37 = vpop.f32.mrf.mxu0  ;;  %v1283_v38 = vpop.f32.mrf.mxu1  ;;  %1919 = vmatmul.msk.bf16.gmra.mxu2 %vm1359_vm4, %v1350_v35 }
 0x24e   : > { %v1174_v41 = vadd.f32 %v2431_v39, %v1173_v37  ;;  %v1284_v44 = vadd.f32 %v2439_v53, %v1283_v38 }
 0x250   : > { %v1215_v43 = vmul.f32 %v2433_v24, %v1174_v41  ;;  %vm1198_vm7 = vcmp.ge.f32.partialorder %v1174_v41, 0.0  ;;  %v1324_v49 = vmul.f32 %v1284_v44, %v2433_v24  ;;  %vm1308_vm8 = vcmp.ge.f32.partialorder %v1284_v44, 0.0 }
 0x252   : > { %v1231_v42 = vsel %vm1198_vm7, %v1174_v41, %v1215_v43  ;;  %v1340_v60 = vsel %vm1308_vm8, %v1284_v44, %v1324_v49 }
 0x253   : > { %1587 = vrot.lane.b32.xlu2 %v1231_v42, %s2001_s19 }
 0x255   : > { %v1175_v47 = vpop.f32.mrf.mxu0  ;;  %v1285_v48 = vpop.f32.mrf.mxu1 }
 0x256   : > { %v1176_v50 = vadd.f32 %v2431_v39, %v1175_v47  ;;  %v1286_v51 = vadd.f32 %v2439_v53, %v1285_v48 }
 0x258   : > { %v1216_v55 = vmul.f32 %v2433_v24, %v1176_v50  ;;  %vm1309_vm9 = vcmp.ge.f32.partialorder %v1286_v51, 0.0  ;;  %v1325_v58 = vmul.f32 %v1286_v51, %v2433_v24  ;;  %vm1199_vm10 = vcmp.ge.f32.partialorder %v1176_v50, 0.0 }
 0x25a   : > { %v1232_v59 = vsel %vm1199_vm10, %v1176_v50, %v1216_v55  ;;  %v1341_v61 = vsel %vm1309_vm9, %v1286_v51, %v1325_v58 }
 0x25b   : > { %1589 = vrot.lane.b32.xlu0 %v1232_v59, %s2001_s19  ;;  %v1351_v1 = vpack.c.bf16 %v1341_v61, %v1340_v60 }
 0x25d   : > { %v1178_v2 = vpop.f32.mrf.mxu0  ;;  %v1288_v3 = vpop.f32.mrf.mxu1  ;;  %1920 = vmatmul.msk.bf16.gmra.mxu2 %vm1359_vm4, %v1351_v1 }
 0x25e   : > { %v1179_v6 = vadd.f32 %v2431_v39, %v1178_v2  ;;  %v1289_v11 = vadd.f32 %v2439_v53, %v1288_v3  ;;  %v2547_v2 = vstv %s1923_s20 }
 0x260   : > { %v1217_v9 = vmul.f32 %v2433_v24, %v1179_v6  ;;  %vm1200_vm12 = vcmp.ge.f32.partialorder %v1179_v6, 0.0  ;;  %v1326_v18 = vmul.f32 %v1289_v11, %v2433_v24  ;;  %vm1310_vm14 = vcmp.ge.f32.partialorder %v1289_v11, 0.0 }
 0x262   : > { %v1233_v14 = vsel %vm1200_vm12, %v1179_v6, %v1217_v9  ;;  %v1342_v31 = vsel %vm1310_vm14, %v1289_v11, %v1326_v18 }
 0x263   : > { %1591 = vrot.lane.b32.xlu1 %v1233_v14, %s2001_s19 }
 0x265   : > { %v1180_v15 = vpop.f32.mrf.mxu0  ;;  %v1290_v16 = vpop.f32.mrf.mxu1 }
 0x266   : > { %v1181_v19 = vadd.f32 %v2431_v39, %v1180_v15  ;;  %v1291_v33 = vadd.f32 %v2439_v53, %v1290_v16  ;;  %v1570_v54 = vpop.permute.xlu2 %1569  ;;  %v2560_v16 = vpop.permute.xlu0 %1521 }
 0x267   : > { %v2521_v25 = vsel %vm1695_vm13, %v1680_v17, %v1570_v54 }
 0x268   : > { %v1218_v26 = vmul.f32 %v2433_v24, %v1181_v19  ;;  %vm1311_vm1 = vcmp.ge.f32.partialorder %v1291_v33, 0.0  ;;  %v1327_v29 = vmul.f32 %v1291_v33, %v2433_v24  ;;  %vm1201_vm15 = vcmp.ge.f32.partialorder %v1181_v19, 0.0 }
 0x26a   : > { %v1343_v32 = vsel %vm1311_vm1, %v1291_v33, %v1327_v29  ;;  %v1234_v45 = vsel %vm1201_vm15, %v1181_v19, %v1218_v26 }
 0x26b   : > { %v1352_v35 = vpack.c.bf16 %v1343_v32, %v1342_v31  ;;  %1593 = vrot.lane.b32.xlu2 %v1234_v45, %s2001_s19  ;;  %v1524_v45 = vpop.permute.xlu1 %1523 }
 0x26d   : > { %v1183_v37 = vpop.f32.mrf.mxu0  ;;  %v1293_v38 = vpop.f32.mrf.mxu1  ;;  %1921 = vmatmul.msk.bf16.gmra.mxu2 %vm1359_vm4, %v1352_v35 }
 0x26e   : > { %v1184_v41 = vadd.f32 %v2431_v39, %v1183_v37  ;;  %v1294_v44 = vadd.f32 %v2439_v53, %v1293_v38 }
 0x270   : > { %v1219_v43 = vmul.f32 %v2433_v24, %v1184_v41  ;;  %vm1202_vm2 = vcmp.ge.f32.partialorder %v1184_v41, 0.0  ;;  %v1328_v49 = vmul.f32 %v1294_v44, %v2433_v24  ;;  %vm1312_vm3 = vcmp.ge.f32.partialorder %v1294_v44, 0.0 }
 0x272   : > { %v1235_v42 = vsel %vm1202_vm2, %v1184_v41, %v1219_v43  ;;  %v1344_v59 = vsel %vm1312_vm3, %v1294_v44, %v1328_v49 }
 0x273   : > { %1595 = vrot.lane.b32.xlu0 %v1235_v42, %s2001_s19 }
 0x275   : > { %v1185_v47 = vpop.f32.mrf.mxu0  ;;  %v1295_v48 = vpop.f32.mrf.mxu1 }
 0x276   : > { %v1186_v50 = vadd.f32 %v2431_v39, %v1185_v47  ;;  %v1296_v51 = vadd.f32 %v2439_v53, %v1295_v48  ;;  %v2545_v53 = vld [vmem:[%s2775_s15] ss:$0 sm:$0xff]  ;;  %v2582_v49 = vpop.permute.xlu1 %1567 }
 0x278   : > { %v1220_v55 = vmul.f32 %v2433_v24, %v1186_v50  ;;  %vm1313_vm5 = vcmp.ge.f32.partialorder %v1296_v51, 0.0  ;;  %v1329_v58 = vmul.f32 %v1296_v51, %v2433_v24  ;;  %vm1203_vm6 = vcmp.ge.f32.partialorder %v1186_v50, 0.0 }
 0x27a   : > { %v1345_v60 = vsel %vm1313_vm5, %v1296_v51, %v1329_v58  ;;  %v1236_v61 = vsel %vm1203_vm6, %v1186_v50, %v1220_v55 }
 0x27b   : > { %v1353_v62 = vpack.c.bf16 %v1345_v60, %v1344_v59  ;;  %1597 = vrot.lane.b32.xlu1 %v1236_v61, %s2001_s19  ;;  %v652_v61 = vadd.f32 %v2341_v36, %v2172_v40 }
 0x27d   : > { %1922 = vmatmul.msk.bf16.gmra.mxu2 %vm1359_vm4, %v1353_v62  ;;  %v1576_v1 = vpop.permute.xlu2 %1575  ;;  %vm672_vm14 = vcmp.ge.f32.partialorder %v652_v61, 0.0 }
 0x27e   : > { %v2540_v39 = vsel %vm1695_vm13, %v2378_v21, %v1576_v1 }
 0x285   : > { %v2567_v54 = vpop.permute.xlu0 %1571 }
 0x28d   : > { %v2593_v62 = vpop.permute.xlu1 %1573 }
 0x290   : > { %v1397_v24 = vpop.f32.mrf.mxu2 }
 0x291   : > { %v1398_v3 = vadd.f32 %v2545_v53, %v1397_v24  ;;  %v689_v24 = vmul.f32 %v2167_v34, %v652_v61 }
 0x293   : > { %v1455_v6 = vmul.f32 %v2547_v2, %v1398_v3  ;;  %vm1438_vm7 = vcmp.ge.f32.partialorder %v1398_v3, 0.0 }
 0x295   : > { %v1582_v9 = vpop.permute.xlu2 %1581  ;;  %v1471_v11 = vsel %vm1438_vm7, %v1398_v3, %v1455_v6  ;;  %v647_v6 = vadd.f32 %v2341_v36, %v2426_v23 }
 0x296   : > { %v2555_v21 = vsel %vm1695_vm13, %v2422_v20, %v1582_v9  ;;  %1631 = vrot.lane.b32.xlu2 %v1471_v11, %s2002_s25  ;;  %v645_v20 = vadd.f32 %v2341_v36, %v2418_v13  ;;  %v705_v11 = vsel %vm672_vm14, %v652_v61, %v689_v24 }
 0x297   : > { %v1692_v40 = vsel %vm585_vm0, %v705_v11, %v2409_v4  ;;  %vm670_vm15 = vcmp.ge.f32.partialorder %v647_v6, 0.0 }
 0x298   : > { %v1399_v14 = vpop.f32.mrf.mxu2  ;;  %v686_v29 = vmul.f32 %v2167_v34, %v645_v20  ;;  %vm669_vm9 = vcmp.ge.f32.partialorder %v645_v20, 0.0 }
 0x299   : > { %v1400_v12 = vadd.f32 %v2545_v53, %v1399_v14 }
 0x29a   : > { %v702_v35 = vsel %vm669_vm9, %v645_v20, %v686_v29  ;;  %vm1712_vm9 = vcmask 457728  }
 0x29b   : > { %v1456_v15 = vmul.f32 %v2547_v2, %v1400_v12  ;;  %vm1439_vm4 = vcmp.ge.f32.partialorder %v1400_v12, 0.0  ;;  %v1689_v13 = vsel %vm585_vm0, %v702_v35, %v1524_v45 }
 0x29d   : > { %v1472_v17 = vsel %vm1439_vm4, %v1400_v12, %v1456_v15  ;;  %v2574_v38 = vpop.permute.xlu0 %1577 }
 0x29e   : > { %1633 = vrot.lane.b32.xlu0 %v1472_v17, %s2002_s25  ;;  %v687_v17 = vmul.f32 %v2167_v34, %v647_v6 }
 0x2a0   : > { %v1402_v18 = vpop.f32.mrf.mxu2  ;;  %v703_v20 = vsel %vm670_vm15, %v647_v6, %v687_v17 }
 0x2a1   : > { %v1403_v19 = vadd.f32 %v2545_v53, %v1402_v18  ;;  %v1690_v4 = vsel %vm585_vm0, %v703_v20, %v2508_v5 }
 0x2a3   : > { %v1457_v33 = vmul.f32 %v2547_v2, %v1403_v19  ;;  %vm1440_vm8 = vcmp.ge.f32.partialorder %v1403_v19, 0.0 }
 0x2a5   : > { %v1473_v26 = vsel %vm1440_vm8, %v1403_v19, %v1457_v33  ;;  %v2603_v14 = vpop.permute.xlu1 %1579 }
 0x2a6   : > { %1635 = vrot.lane.b32.xlu1 %v1473_v26, %s2002_s25 }
 0x2a8   : > { %v1404_v31 = vpop.f32.mrf.mxu2 }
 0x2a9   : > { %v1405_v32 = vadd.f32 %v2545_v53, %v1404_v31 }
 0x2ab   : > { %v1458_v37 = vmul.f32 %v2547_v2, %v1405_v32  ;;  %vm1441_vm10 = vcmp.ge.f32.partialorder %v1405_v32, 0.0 }
 0x2ad   : > { %v1588_v41 = vpop.permute.xlu2 %1587  ;;  %v1474_v43 = vsel %vm1441_vm10, %v1405_v32, %v1458_v37  ;;  %vm1729_vm10 = vcmask 523264  }
 0x2ae   : > { %v2577_v44 = vsel %vm1695_vm13, %v1689_v13, %v1588_v41  ;;  %1637 = vrot.lane.b32.xlu2 %v1474_v43, %s2002_s25 }
 0x2b0   : > { %v1407_v42 = vpop.f32.mrf.mxu2 }
 0x2b1   : > { %v1408_v47 = vadd.f32 %v2545_v53, %v1407_v42 }
 0x2b3   : > { %v1459_v48 = vmul.f32 %v2547_v2, %v1408_v47  ;;  %vm1442_vm11 = vcmp.ge.f32.partialorder %v1408_v47, 0.0 }
 0x2b5   : > { %v1584_v50 = vpop.permute.xlu0 %1583  ;;  %v1475_v51 = vsel %vm1442_vm11, %v1408_v47, %v1459_v48 }
 0x2b6   : > { %v2586_v55 = vsel %vm1695_vm13, %v2413_v7, %v1584_v50  ;;  %1639 = vrot.lane.b32.xlu0 %v1475_v51, %s2002_s25 }
 0x2b8   : > { %v1409_v58 = vpop.f32.mrf.mxu2 }
 0x2b9   : > { %v1410_v59 = vadd.f32 %v2545_v53, %v1409_v58 }
 0x2bb   : > { %v1460_v60 = vmul.f32 %v2547_v2, %v1410_v59  ;;  %vm1443_vm12 = vcmp.ge.f32.partialorder %v1410_v59, 0.0 }
 0x2bd   : > { %v1476_v1 = vsel %vm1443_vm12, %v1410_v59, %v1460_v60  ;;  %v2614_v26 = vpop.permute.xlu1 %1585  ;;  %v620_v59 = vadd.f32 %v2341_v36, %v2308_v63 }
 0x2be   : > { %1641 = vrot.lane.b32.xlu1 %v1476_v1, %s2002_s25 }
 0x2bf   : > { %vm659_vm7 = vcmp.ge.f32.partialorder %v620_v59, 0.0 }
 0x2c0   : > { %v1412_v7 = vpop.f32.mrf.mxu2 }
 0x2c1   : > { %v1413_v3 = vadd.f32 %v2545_v53, %v1412_v7  ;;  %v676_v7 = vmul.f32 %v2167_v34, %v620_v59 }
 0x2c3   : > { %v1461_v9 = vmul.f32 %v2547_v2, %v1413_v3  ;;  %vm1444_vm1 = vcmp.ge.f32.partialorder %v1413_v3, 0.0  ;;  %v692_v6 = vsel %vm659_vm7, %v620_v59, %v676_v7 }
 0x2c5   : > { %v1594_v12 = vpop.permute.xlu2 %1593  ;;  %v1477_v15 = vsel %vm1444_vm1, %v1413_v3, %v1461_v9 }
 0x2c6   : > { %v2607_v18 = vsel %vm1695_vm13, %v1692_v40, %v1594_v12  ;;  %1643 = vrot.lane.b32.xlu2 %v1477_v15, %s2002_s25  ;;  %v1679_v15 = vsel %vm585_vm0, %v692_v6, %v2350_v56 }
 0x2c8   : > { %v1414_v23 = vpop.f32.mrf.mxu2 }
 0x2c9   : > { %v1415_v19 = vadd.f32 %v2545_v53, %v1414_v23 }
 0x2cb   : > { %v1462_v33 = vmul.f32 %v2547_v2, %v1415_v19  ;;  %vm1445_vm2 = vcmp.ge.f32.partialorder %v1415_v19, 0.0 }
 0x2cd   : > { %v1590_v29 = vpop.permute.xlu0 %1589  ;;  %v1478_v31 = vsel %vm1445_vm2, %v1415_v19, %v1462_v33 }
 0x2ce   : > { %v2617_v32 = vsel %vm1695_vm13, %v1690_v4, %v1590_v29  ;;  %1645 = vrot.lane.b32.xlu0 %v1478_v31, %s2002_s25 }
 0x2d0   : > { %v1417_v45 = vpop.f32.mrf.mxu2 }
 0x2d1   : > { %v1418_v35 = vadd.f32 %v2545_v53, %v1417_v45 }
 0x2d3   : > { %v1463_v37 = vmul.f32 %v2547_v2, %v1418_v35  ;;  %vm1446_vm3 = vcmp.ge.f32.partialorder %v1418_v35, 0.0 }
 0x2d5   : > { %v1592_v13 = vpop.permute.xlu1 %1591  ;;  %v1479_v41 = vsel %vm1446_vm3, %v1418_v35, %v1463_v37 }
 0x2d6   : > { %v2624_v5 = vsel %vm1695_vm13, %v2386_v28, %v1592_v13  ;;  %1647 = vrot.lane.b32.xlu1 %v1479_v41, %s2002_s25  ;;  %v657_v28 = vadd.f32 %v2341_v36, %v2187_v52 }
 0x2d8   : > { %v1419_v43 = vpop.f32.mrf.mxu2  ;;  %v691_v24 = vmul.f32 %v2167_v34, %v657_v28  ;;  %vm674_vm4 = vcmp.ge.f32.partialorder %v657_v28, 0.0 }
 0x2d9   : > { %v1420_v42 = vadd.f32 %v2545_v53, %v1419_v43 }
 0x2da   : > { %v707_v9 = vsel %vm674_vm4, %v657_v28, %v691_v24 }
 0x2db   : > { %v1464_v47 = vmul.f32 %v2547_v2, %v1420_v42  ;;  %vm1447_vm5 = vcmp.ge.f32.partialorder %v1420_v42, 0.0 }
 0x2dd   : > { %v1480_v48 = vsel %vm1447_vm5, %v1420_v42, %v1464_v47 }
 0x2de   : > { %1649 = vrot.lane.b32.xlu2 %v1480_v48, %s2002_s25 }
 0x2e0   : > { %v1422_v50 = vpop.f32.mrf.mxu2 }
 0x2e1   : > { %v1423_v51 = vadd.f32 %v2545_v53, %v1422_v50 }
 0x2e3   : > { %v1465_v58 = vmul.f32 %v2547_v2, %v1423_v51  ;;  %vm1448_vm6 = vcmp.ge.f32.partialorder %v1423_v51, 0.0 }
 0x2e5   : > { %v1596_v60 = vpop.permute.xlu0 %1595  ;;  %v1481_v61 = vsel %vm1448_vm6, %v1423_v51, %v1465_v58 }
 0x2e6   : > { %v2638_v1 = vsel %vm1695_vm13, %v2373_v10, %v1596_v60  ;;  %1651 = vrot.lane.b32.xlu0 %v1481_v61, %s2002_s25  ;;  %v1694_v10 = vsel %vm585_vm0, %v707_v9, %v2551_v8  ;;  %v1696_v8 = vsel %vm1695_vm13, %v1679_v15, %v2582_v49  ;;  %v627_v49 = vadd.f32 %v2341_v36, %v2335_v27 }
 0x2e8   : > { %v1424_v3 = vpop.f32.mrf.mxu2  ;;  %v679_v35 = vmul.f32 %v2167_v34, %v627_v49  ;;  %vm662_vm14 = vcmp.ge.f32.partialorder %v627_v49, 0.0 }
 0x2e9   : > { %v1425_v52 = vadd.f32 %v2545_v53, %v1424_v3 }
 0x2ea   : > { %v695_v43 = vsel %vm662_vm14, %v627_v49, %v679_v35 }
 0x2eb   : > { %v1466_v63 = vmul.f32 %v2547_v2, %v1425_v52  ;;  %vm1449_vm8 = vcmp.ge.f32.partialorder %v1425_v52, 0.0  ;;  %v1682_v27 = vsel %vm585_vm0, %v695_v43, %v2399_v30 }
 0x2ec   : > { %v1699_v36 = vsel %vm1695_vm13, %v1682_v27, %v2593_v62 }
 0x2ed   : > { %v1598_v11 = vpop.permute.xlu1 %1597  ;;  %v1482_v40 = vsel %vm1449_vm8, %v1425_v52, %v1466_v63 }
 0x2ee   : > { %v2648_v12 = vsel %vm1695_vm13, %v1694_v10, %v1598_v11  ;;  %1653 = vrot.lane.b32.xlu1 %v1482_v40, %s2002_s25 }
 0x2f0   : > { %v1427_v17 = vpop.f32.mrf.mxu2  ;;  %v1632_v23 = vpop.permute.xlu2 %1631 }
 0x2f1   : > { %v1428_v19 = vadd.f32 %v2545_v53, %v1427_v17  ;;  %v1713_v20 = vsel %vm1712_vm9, %v1696_v8, %v1632_v23 }
 0x2f2   : > { %1730 = vst.msk [vmem:[%s2658_s28] sm:$0xff] %vm1729_vm10, %v1713_v20 }
 0x2f3   : > { %v1467_v56 = vmul.f32 %v2547_v2, %v1428_v19  ;;  %vm1450_vm11 = vcmp.ge.f32.partialorder %v1428_v19, 0.0 }
 0x2f5   : > { %v1483_v33 = vsel %vm1450_vm11, %v1428_v19, %v1467_v56 }
 0x2f6   : > { %1655 = vrot.lane.b32.xlu2 %v1483_v33, %s2002_s25 }
 0x2f8   : > { %v1429_v4 = vpop.f32.mrf.mxu2 }
 0x2f9   : > { %v1430_v29 = vadd.f32 %v2545_v53, %v1429_v4 }
 0x2fb   : > { %v1468_v31 = vmul.f32 %v2547_v2, %v1430_v29  ;;  %vm1451_vm12 = vcmp.ge.f32.partialorder %v1430_v29, 0.0 }
 0x2fd   : > { %v1484_v45 = vsel %vm1451_vm12, %v1430_v29, %v1468_v31 }
 0x2fe   : > { %1657 = vrot.lane.b32.xlu0 %v1484_v45, %s2002_s25 }
 0x300   : > { %v1432_v37 = vpop.f32.mrf.mxu2 }
 0x301   : > { %v1433_v13 = vadd.f32 %v2545_v53, %v1432_v37 }
 0x303   : > { %v1469_v41 = vmul.f32 %v2547_v2, %v1433_v13  ;;  %vm1452_vm1 = vcmp.ge.f32.partialorder %v1433_v13, 0.0 }
 0x305   : > { %v1485_v42 = vsel %vm1452_vm1, %v1433_v13, %v1469_v41 }
 0x306   : > { %1659 = vrot.lane.b32.xlu1 %v1485_v42, %s2002_s25 }
 0x308   : > { %v1434_v47 = vpop.f32.mrf.mxu2  ;;  %v1638_v48 = vpop.permute.xlu2 %1637 }
 0x309   : > { %v1435_v50 = vadd.f32 %v2545_v53, %v1434_v47  ;;  %v1716_v51 = vsel %vm1712_vm9, %v1699_v36, %v1638_v48  ;;  %v1698_v53 = vsel %vm1695_vm13, %v2353_v57, %v2567_v54  ;;  %v1971_v54 = vld [vmem:[%s2763_s3] ss:$0 sm:$0xff] }
 0x30a   : > { %1733 = vst.msk [vmem:[%s2658_s28 + $0x18] sm:$0xff] %vm1729_vm10, %v1716_v51  ;;  %v642_v7 = vadd.f32 %v1971_v54, %v2404_v0 }
 0x30b   : > { %v1470_v58 = vmul.f32 %v2547_v2, %v1435_v50  ;;  %vm1453_vm15 = vcmp.ge.f32.partialorder %v1435_v50, 0.0  ;;  %v1702_v2 = vsel %vm1695_vm13, %v2394_v46, %v2603_v14  ;;  %v1701_v14 = vsel %vm1695_vm13, %v2381_v22, %v2574_v38 }
 0x30c   : > { %v685_v46 = vmul.f32 %v2167_v34, %v642_v7  ;;  %vm668_vm2 = vcmp.ge.f32.partialorder %v642_v7, 0.0 }
 0x30d   : > { %v1486_v28 = vsel %vm1453_vm15, %v1435_v50, %v1470_v58 }
 0x30e   : > { %1661 = vrot.lane.b32.xlu2 %v1486_v28, %s2002_s25  ;;  %v701_v52 = vsel %vm668_vm2, %v642_v7, %v685_v46 }
 0x30f   : > { %v1688_v63 = vsel %vm585_vm0, %v701_v52, %v2560_v16 }
 0x310   : > { %v1634_v30 = vpop.permute.xlu0 %1633  ;;  %v1705_v34 = vsel %vm1695_vm13, %v1688_v63, %v2614_v26 }
 0x311   : > { %v1714_v62 = vsel %vm1712_vm9, %v2521_v25, %v1634_v30 }
 0x312   : > { %1731 = vst.msk [vmem:[%s2658_s28 + $0x8] sm:$0xff] %vm1729_vm10, %v1714_v62 }
 0x318   : > { %v1636_v59 = vpop.permute.xlu1 %1635 }
 0x319   : > { %v1715_v60 = vsel %vm1712_vm9, %v1698_v53, %v1636_v59 }
 0x31a   : > { %1732 = vst.msk [vmem:[%s2658_s28 + $0x10] sm:$0xff] %vm1729_vm10, %v1715_v60 }
 0x320   : > { %v1644_v61 = vpop.permute.xlu2 %1643 }
 0x321   : > { %v1719_v24 = vsel %vm1712_vm9, %v1702_v2, %v1644_v61 }
 0x322   : > { %1736 = vst.msk [vmem:[%s2658_s28 + $0x30] sm:$0xff] %vm1729_vm10, %v1719_v24 }
 0x328   : > { %v1640_v25 = vpop.permute.xlu0 %1639 }
 0x329   : > { %v1717_v57 = vsel %vm1712_vm9, %v2540_v39, %v1640_v25 }
 0x32a   : > { %1734 = vst.msk [vmem:[%s2658_s28 + $0x20] sm:$0xff] %vm1729_vm10, %v1717_v57 }
 0x330   : > { %v1642_v3 = vpop.permute.xlu1 %1641 }
 0x331   : > { %v1718_v39 = vsel %vm1712_vm9, %v1701_v14, %v1642_v3 }
 0x332   : > { %1735 = vst.msk [vmem:[%s2658_s28 + $0x28] sm:$0xff] %vm1729_vm10, %v1718_v39 }
 0x338   : > { %v1650_v0 = vpop.permute.xlu2 %1649 }
 0x339   : > { %v1722_v6 = vsel %vm1712_vm9, %v1705_v34, %v1650_v0 }
 0x33a   : > { %1739 = vst.msk [vmem:[%s2658_s28 + $0x48] sm:$0xff] %vm1729_vm10, %v1722_v6 }
 0x340   : > { %v1646_v22 = vpop.permute.xlu0 %1645 }
 0x341   : > { %v1720_v38 = vsel %vm1712_vm9, %v2555_v21, %v1646_v22 }
 0x342   : > { %1737 = vst.msk [vmem:[%s2658_s28 + $0x38] sm:$0xff] %vm1729_vm10, %v1720_v38 }
 0x348   : > { %v1648_v9 = vpop.permute.xlu1 %1647 }
 0x349   : > { %v1721_v16 = vsel %vm1712_vm9, %v2586_v55, %v1648_v9 }
 0x34a   : > { %1738 = vst.msk [vmem:[%s2658_s28 + $0x40] sm:$0xff] %vm1729_vm10, %v1721_v16 }
 0x350   : > { %v1656_v26 = vpop.permute.xlu2 %1655 }
 0x351   : > { %v1725_v10 = vsel %vm1712_vm9, %v2624_v5, %v1656_v26 }
 0x352   : > { %1742 = vst.msk [vmem:[%s2658_s28 + $0x60] sm:$0xff] %vm1729_vm10, %v1725_v10 }
 0x358   : > { %v1652_v11 = vpop.permute.xlu0 %1651 }
 0x359   : > { %v1723_v21 = vsel %vm1712_vm9, %v2577_v44, %v1652_v11 }
 0x35a   : > { %1740 = vst.msk [vmem:[%s2658_s28 + $0x50] sm:$0xff] %vm1729_vm10, %v1723_v21 }
 0x360   : > { %v1654_v40 = vpop.permute.xlu1 %1653 }
 0x361   : > { %v1724_v55 = vsel %vm1712_vm9, %v2617_v32, %v1654_v40 }
 0x362   : > { %1741 = vst.msk [vmem:[%s2658_s28 + $0x58] sm:$0xff] %vm1729_vm10, %v1724_v55 }
 0x368   : > { %v1662_v15 = vpop.permute.xlu2 %1661 }
 0x369   : > { %v1728_v8 = vsel %vm1712_vm9, %v2648_v12, %v1662_v15 }
 0x36a   : > { %1745 = vst.msk [vmem:[%s2658_s28 + $0x78] sm:$0xff] %vm1729_vm10, %v1728_v8 }
 0x370   : > { %v1658_v5 = vpop.permute.xlu0 %1657 }
 0x371   : > { %v1726_v17 = vsel %vm1712_vm9, %v2607_v18, %v1658_v5 }
 0x372   : > { %1743 = vst.msk [vmem:[%s2658_s28 + $0x68] sm:$0xff] %vm1729_vm10, %v1726_v17 }
 0x378   : > { %v1660_v44 = vpop.permute.xlu1 %1659 }
 0x379   : > { %v1727_v23 = vsel %vm1712_vm9, %v2638_v1, %v1660_v44 }
 0x37a   : > { %1744 = vst.msk [vmem:[%s2658_s28 + $0x70] sm:$0xff] %vm1729_vm10, %v1727_v23 }
 0x37b PF: > { %s27_s21 = sadd.s32 1, %s1997_s21  }
 0x37c   : > { %p24_p7 = scmp.ge.s32.totalorder %s27_s21, 4  }
 0x37e   :  { %26 = sbr.rel (!%p24_p7) target bundleno = 3 (0x3), region = 119 }
 0x383   :  { %1768 = vsyncpa [#allocation3], 1 }
 0x384   :  { %1770 = vsyncpa [#allocation3 + $0x1], 1 }

</bundles_post_ra>
